<compile_context>
chip_gen: v7x
topology: tpu7x:2x2x1
jax: 0.10.0
libtpu: 0.0.40
codegen_flags: <defaults>
</compile_context>

<pallas_src>
import functools
import math

import jax
import jax.numpy as jnp
import numpy as np
from jax.experimental import pallas as pl
from jax.experimental.pallas import tpu as pltpu


# ---------------------------------------------------------------------------
# shared math helpers (pure jnp; used inside the Pallas kernel and reference)
# ---------------------------------------------------------------------------
def _matmul_nt(a, b):
    """a [M, K] @ b[N, K]^T -> [M, N] (contract last dims, f32 accumulation)."""
    return jax.lax.dot_general(
        a, b, (((1,), (1,)), ((), ())), preferred_element_type=jnp.float32
    )


def _matmul_nn(a, b):
    """a [M, K] @ b[K, N] -> [M, N] (f32 accumulation)."""
    return jax.lax.dot_general(
        a, b, (((1,), (0,)), ((), ())), preferred_element_type=jnp.float32
    )


def _layernorm(x, w, b, eps=1e-5):
    mu = jnp.mean(x, axis=-1, keepdims=True)
    var = jnp.mean((x - mu) ** 2, axis=-1, keepdims=True)
    return (x - mu) * jax.lax.rsqrt(var + eps) * w + b


# ---------------------------------------------------------------------------
# in-kernel multi-head attention for ONE batch element
# ---------------------------------------------------------------------------
def _mha(q_in, kv_in, wqkv, bqkv, wo, bo, mask, n_heads):
    """Multi-head attention (eval-mode, no dropout) for one batch element.

    q_in:  [Tq, D] f32      kv_in: [Tk, D] f32, or None => self-attention
    wqkv:  [3D, D] bf16 (PyTorch in_proj layout)   bqkv: [1, 3D] f32
    wo:    [D, D]  bf16                            bo:   [1, D]  f32
    mask:  [Tq, Tk] additive f32, or None
    """
    bf16 = jnp.bfloat16
    tq, d_model = q_in.shape
    hd = d_model // n_heads
    scale = 1.0 / math.sqrt(hd)

    # ---- stacked, lane-dense projections: 1 matmul (self) / 2 (cross) ----
    if kv_in is None:                       # self-attention: q = k = v source
        qkv = _matmul_nt(q_in.astype(bf16), wqkv) + bqkv            # [Tq, 3D]
        q_p = qkv[:, 0:d_model]
        k_p = qkv[:, d_model:2 * d_model]
        v_p = qkv[:, 2 * d_model:]
        tk = tq
    else:                                   # cross-attention
        tk = kv_in.shape[0]
        q_p = _matmul_nt(q_in.astype(bf16), wqkv[0:d_model, :]) + bqkv[:, 0:d_model]
        kv = _matmul_nt(kv_in.astype(bf16), wqkv[d_model:, :]) + bqkv[:, d_model:]
        k_p = kv[:, 0:d_model]
        v_p = kv[:, d_model:]

    # ---- split heads into the (single) einsum batch dim; cast bf16 once ----
    def split_heads(t, n_rows):
        return jnp.transpose(t.reshape(n_rows, n_heads, hd), (1, 0, 2)).astype(bf16)

    q = split_heads(q_p, tq)                # [H, Tq, hd] bf16
    k = split_heads(k_p, tk)                # [H, Tk, hd] bf16
    v = split_heads(v_p, tk)                # [H, Tk, hd] bf16

    # ---- scores / softmax in f32 ----
    s = jnp.einsum("hqe,hke->hqk", q, k,
                   preferred_element_type=jnp.float32) * scale      # [H, Tq, Tk]
    if mask is not None:
        s = s + mask[None, :, :]
    s = s - jnp.max(s, axis=-1, keepdims=True)
    p = jnp.exp(s)
    p = p * pl.reciprocal(jnp.sum(p, axis=-1, keepdims=True), approx=True)

    # ---- PV, merge heads back into lanes, single output projection ----
    o = jnp.einsum("hqk,hke->hqe", p.astype(bf16), v,
                   preferred_element_type=jnp.float32)               # [H, Tq, hd]
    o = jnp.transpose(o, (1, 0, 2)).reshape(tq, d_model)             # [Tq, D]
    return _matmul_nt(o.astype(bf16), wo) + bo


# ---------------------------------------------------------------------------
# Pallas kernel: one full DecoderLayer for one batch element (grid over batch)
# ---------------------------------------------------------------------------
def decoder_layer_kernel(x_ref, enc_ref, mask_ref, w_ref, b_ref, out_ref,
                         *, n_heads, d_ff):
    bf16 = jnp.bfloat16
    t, d = x_ref.shape
    d3 = 3 * d

    # static row offsets into the packed bf16 weight slab [8D + 2*d_ff, D]
    o_wo_s = d3
    o_qkv_c = d3 + d
    o_wo_c = 2 * d3 + d
    o_w1 = 2 * d3 + 2 * d
    o_w2t = o_w1 + d_ff

    wqkv_s = w_ref[0:d3, :]
    wo_s = w_ref[o_wo_s:o_wo_s + d, :]
    wqkv_c = w_ref[o_qkv_c:o_qkv_c + d3, :]
    wo_c = w_ref[o_wo_c:o_wo_c + d, :]
    w1 = w_ref[o_w1:o_w1 + d_ff, :]
    w2t = w_ref[o_w2t:o_w2t + d_ff, :]          # linear2 weight, transposed

    # f32 bias / LayerNorm slab [12, 3D]; each row holds one parameter vector
    bqkv_s = b_ref[0:1, 0:d3]
    bo_s = b_ref[1:2, 0:d]
    bqkv_c = b_ref[2:3, 0:d3]
    bo_c = b_ref[3:4, 0:d]
    b1 = b_ref[4:5, 0:d_ff]
    b2 = b_ref[5:6, 0:d]
    n1w, n1b = b_ref[6:7, 0:d], b_ref[7:8, 0:d]
    n2w, n2b = b_ref[8:9, 0:d], b_ref[9:10, 0:d]
    n3w, n3b = b_ref[10:11, 0:d], b_ref[11:12, 0:d]

    x = x_ref[...]                    # [T, D] f32
    enc = enc_ref[...]                # [S, D] f32

    # --- self-attention + residual + norm1 (dropout = identity in eval) ---
    a = _mha(x, None, wqkv_s, bqkv_s, wo_s, bo_s, mask_ref[...], n_heads)
    x = _layernorm(x + a, n1w, n1b)

    # --- cross-attention + residual + norm2 ---
    c = _mha(x, enc, wqkv_c, bqkv_c, wo_c, bo_c, None, n_heads)
    x = _layernorm(x + c, n2w, n2b)

    # --- position-wise feed-forward + residual + norm3 ---
    h = jnp.maximum(_matmul_nt(x.astype(bf16), w1) + b1, 0.0)
    f = _matmul_nn(h.astype(bf16), w2t) + b2
    x = _layernorm(x + f, n3w, n3b)

    out_ref[...] = x


# ---------------------------------------------------------------------------
# wrapper: parameter packing (once) + pallas_call
# ---------------------------------------------------------------------------
def prep_decoder_layer_params(raw):
    """Pack PyTorch-layout params into two DMA slabs: bf16 weights, f32 biases/LN."""
    (wqkv_s, bqkv_s, wo_s, bo_s,
     wqkv_c, bqkv_c, wo_c, bo_c,
     w1, b1, w2, b2,
     n1w, n1b, n2w, n2b, n3w, n3b) = raw
    d_model = wo_s.shape[0]
    width = 3 * d_model

    # weight slab [8D + 2*d_ff, D] bf16 (linear2 stored transposed so every
    # block shares the same D-wide column count)
    w_slab = jnp.concatenate(
        [wqkv_s, wo_s, wqkv_c, wo_c, w1, w2.T], axis=0).astype(jnp.bfloat16)

    def row(v):
        v = v.astype(jnp.float32)
        return jnp.pad(v, (0, width - v.shape[0]))[None, :]

    b_slab = jnp.concatenate(
        [row(bqkv_s), row(bo_s), row(bqkv_c), row(bo_c), row(b1), row(b2),
         row(n1w), row(n1b), row(n2w), row(n2b), row(n3w), row(n3b)], axis=0)
    return w_slab, b_slab


@functools.partial(jax.jit, static_argnums=(4,))
def decoder_layer_forward(x_tbd, enc_sbd, w_slab, b_slab, n_heads, tgt_mask=None):
    """DecoderLayer.forward.  x: [T, B, D], enc_out: [S, B, D] (seq-first)."""
    T, B, D = x_tbd.shape
    S = enc_sbd.shape[0]
    d_ff = (w_slab.shape[0] - 8 * D) // 2

    x_btd = jnp.transpose(x_tbd, (1, 0, 2))       # tiny; done by XLA outside kernel
    enc_bsd = jnp.transpose(enc_sbd, (1, 0, 2))
    if tgt_mask is None:
        tgt_mask = jnp.zeros((T, T), jnp.float32)

    kernel = functools.partial(decoder_layer_kernel, n_heads=n_heads, d_ff=d_ff)
    out_btd = pl.pallas_call(
        kernel,
        out_shape=jax.ShapeDtypeStruct((B, T, D), jnp.float32),
        grid=(B,),
        in_specs=[
            pl.BlockSpec((None, T, D), lambda b: (b, 0, 0)),     # x (this batch)
            pl.BlockSpec((None, S, D), lambda b: (b, 0, 0)),     # enc (this batch)
            pl.BlockSpec((T, T), lambda b: (0, 0)),              # additive mask
            pl.BlockSpec(w_slab.shape, lambda b: (0, 0)),        # bf16 weight slab
            pl.BlockSpec(b_slab.shape, lambda b: (0, 0)),        # f32 bias/LN slab
        ],
        out_specs=pl.BlockSpec((None, T, D), lambda b: (b, 0, 0)),
        compiler_params=pltpu.CompilerParams(
            dimension_semantics=("parallel",)),   # v7x: shard batch over both TCs
    )(x_btd, enc_bsd, tgt_mask.astype(jnp.float32), w_slab, b_slab)
    return jnp.transpose(out_btd, (1, 0, 2))


# ---------------------------------------------------------------------------
# deterministic parameter init (PyTorch parameter layouts)
# ---------------------------------------------------------------------------
def init_layer_params(key, d_model, d_ff):
    ks = jax.random.split(key, 16)

    def u(k, shape, scale=0.1):
        return jax.random.uniform(k, shape, jnp.float32, -scale, scale)

    wqkv_s = u(ks[0], (3 * d_model, d_model)); bqkv_s = u(ks[1], (3 * d_model,))
    wo_s = u(ks[2], (d_model, d_model));       bo_s = u(ks[3], (d_model,))
    wqkv_c = u(ks[4], (3 * d_model, d_model)); bqkv_c = u(ks[5], (3 * d_model,))
    wo_c = u(ks[6], (d_model, d_model));       bo_c = u(ks[7], (d_model,))
    w1 = u(ks[8], (d_ff, d_model));  b1 = u(ks[9], (d_ff,))
    w2 = u(ks[10], (d_model, d_ff)); b2 = u(ks[11], (d_model,))
    n1w = 1.0 + u(ks[12], (d_model,)); n1b = u(ks[13], (d_model,))
    n2w = 1.0 + u(ks[14], (d_model,)); n2b = u(ks[15], (d_model,))
    n3w = jnp.ones((d_model,), jnp.float32)
    n3b = jnp.zeros((d_model,), jnp.float32)
    return (wqkv_s, bqkv_s, wo_s, bo_s, wqkv_c, bqkv_c, wo_c, bo_c,
            w1, b1, w2, b2, n1w, n1b, n2w, n2b, n3w, n3b)


# ---------------------------------------------------------------------------
# independent pure-JAX f32 reference (mirrors the PyTorch module structure)
# ---------------------------------------------------------------------------
def _ref_mha(q_in, kv_in, wqkv, bqkv, wo, bo, n_heads, mask):
    d_model = q_in.shape[-1]
    hd = d_model // n_heads
    q = q_in @ wqkv[0:d_model].T + bqkv[0:d_model]
    k = kv_in @ wqkv[d_model:2 * d_model].T + bqkv[d_model:2 * d_model]
    v = kv_in @ wqkv[2 * d_model:].T + bqkv[2 * d_model:]
    heads = []
    for h in range(n_heads):
        qh = q[:, h * hd:(h + 1) * hd]
        kh = k[:, h * hd:(h + 1) * hd]
        vh = v[:, h * hd:(h + 1) * hd]
        s = qh @ kh.T / math.sqrt(hd)
        if mask is not None:
            s = s + mask
        heads.append(jax.nn.softmax(s, axis=-1) @ vh)
    o = jnp.concatenate(heads, axis=-1)
    return o @ wo.T + bo


def _ref_layer(x, enc, raw, n_heads, tgt_mask):
    (wqkv_s, bqkv_s, wo_s, bo_s,
     wqkv_c, bqkv_c, wo_c, bo_c,
     w1, b1, w2, b2,
     n1w, n1b, n2w, n2b, n3w, n3b) = raw
    a = _ref_mha(x, x, wqkv_s, bqkv_s, wo_s, bo_s, n_heads, tgt_mask)
    x = _layernorm(x + a, n1w, n1b)
    c = _ref_mha(x, enc, wqkv_c, bqkv_c, wo_c, bo_c, n_heads, None)
    x = _layernorm(x + c, n2w, n2b)
    h = jnp.maximum(x @ w1.T + b1, 0.0)
    f = h @ w2.T + b2
    return _layernorm(x + f, n3w, n3b)


def ref_forward(x_tbd, enc_sbd, raw, n_heads, tgt_mask):
    fn = lambda xb, eb: _ref_layer(xb, eb, raw, n_heads, tgt_mask)
    return jax.vmap(fn, in_axes=(1, 1), out_axes=1)(x_tbd, enc_sbd)


# ---------------------------------------------------------------------------
if __name__ == "__main__":
    d_model, n_heads, d_ff = 32, 4, 64
    tgt_len, src_len, batch = 8, 16, 2

    key = jax.random.PRNGKey(0)
    kx, ke, kp = jax.random.split(key, 3)
    x = jax.random.normal(kx, (tgt_len, batch, d_model), jnp.float32)
    enc_out = jax.random.normal(ke, (src_len, batch, d_model), jnp.float32)

    raw_params = init_layer_params(kp, d_model, d_ff)
    w_slab, b_slab = prep_decoder_layer_params(raw_params)

    # causal target mask (additive float, stand-in for PyTorch's -inf bool mask)
    tri = jnp.triu(jnp.ones((tgt_len, tgt_len), jnp.float32), 1)
    tgt_mask = jnp.where(tri > 0, jnp.float32(-1e9), jnp.float32(0.0))

    out = decoder_layer_forward(x, enc_out, w_slab, b_slab, n_heads, tgt_mask)
    out = jax.block_until_ready(out)

    ref = jax.block_until_ready(ref_forward(x, enc_out, raw_params, n_heads, tgt_mask))
    np.testing.assert_allclose(np.asarray(out), np.asarray(ref), rtol=5e-2, atol=5e-2)

    print("KERNEL_OK")
</pallas_src>

<mosaic_0001>
module attributes {stable_mosaic.version = 11 : i64} {
  func.func @decoder_layer_kernel(%arg0: i32, %arg1: memref<1x8x32xf32, #tpu.memory_space<vmem>>, %arg2: memref<1x16x32xf32, #tpu.memory_space<vmem>>, %arg3: memref<8x8xf32, #tpu.memory_space<vmem>>, %arg4: memref<384x32xbf16, #tpu.memory_space<vmem>>, %arg5: memref<12x96xf32, #tpu.memory_space<vmem>>, %arg6: memref<1x8x32xf32, #tpu.memory_space<vmem>>) attributes {dimension_semantics = [#tpu.dimension_semantics<parallel>], iteration_bounds = array<i64: 2>, scalar_prefetch = 0 : i64, scratch_operands = 0 : i64, tpu.core_type = #tpu.core_type<tc>, window_params = [{transform_indices = @transform_0, window_bounds = array<i64: 1, 8, 32>}, {transform_indices = @transform_1, window_bounds = array<i64: 1, 16, 32>}, {pipeline_mode = #tpu.pipeline_mode<synchronous>, transform_indices = @transform_2, window_bounds = array<i64: 8, 8>}, {pipeline_mode = #tpu.pipeline_mode<synchronous>, transform_indices = @transform_3, window_bounds = array<i64: 384, 32>}, {pipeline_mode = #tpu.pipeline_mode<synchronous>, transform_indices = @transform_4, window_bounds = array<i64: 12, 96>}, {transform_indices = @transform_5, window_bounds = array<i64: 1, 8, 32>}]} {
    %c0 = arith.constant 0 : index
    %c0_0 = arith.constant 0 : index
    %0 = vector.load %arg4[%c0, %c0_0] : memref<384x32xbf16, #tpu.memory_space<vmem>>, vector<96x32xbf16>
    %c96 = arith.constant 96 : index
    %c0_1 = arith.constant 0 : index
    %1 = vector.load %arg4[%c96, %c0_1] : memref<384x32xbf16, #tpu.memory_space<vmem>>, vector<32x32xbf16>
    %c128 = arith.constant 128 : index
    %c0_2 = arith.constant 0 : index
    %2 = vector.load %arg4[%c128, %c0_2] : memref<384x32xbf16, #tpu.memory_space<vmem>>, vector<96x32xbf16>
    %c224 = arith.constant 224 : index
    %c0_3 = arith.constant 0 : index
    %3 = vector.load %arg4[%c224, %c0_3] : memref<384x32xbf16, #tpu.memory_space<vmem>>, vector<32x32xbf16>
    %c256 = arith.constant 256 : index
    %c0_4 = arith.constant 0 : index
    %4 = vector.load %arg4[%c256, %c0_4] : memref<384x32xbf16, #tpu.memory_space<vmem>>, vector<64x32xbf16>
    %c320 = arith.constant 320 : index
    %c0_5 = arith.constant 0 : index
    %5 = vector.load %arg4[%c320, %c0_5] : memref<384x32xbf16, #tpu.memory_space<vmem>>, vector<64x32xbf16>
    %c0_6 = arith.constant 0 : index
    %c0_7 = arith.constant 0 : index
    %6 = vector.load %arg5[%c0_6, %c0_7] : memref<12x96xf32, #tpu.memory_space<vmem>>, vector<1x96xf32>
    %c1 = arith.constant 1 : index
    %c0_8 = arith.constant 0 : index
    %7 = vector.load %arg5[%c1, %c0_8] : memref<12x96xf32, #tpu.memory_space<vmem>>, vector<1x32xf32>
    %c2 = arith.constant 2 : index
    %c0_9 = arith.constant 0 : index
    %8 = vector.load %arg5[%c2, %c0_9] : memref<12x96xf32, #tpu.memory_space<vmem>>, vector<1x96xf32>
    %c3 = arith.constant 3 : index
    %c0_10 = arith.constant 0 : index
    %9 = vector.load %arg5[%c3, %c0_10] : memref<12x96xf32, #tpu.memory_space<vmem>>, vector<1x32xf32>
    %c4 = arith.constant 4 : index
    %c0_11 = arith.constant 0 : index
    %10 = vector.load %arg5[%c4, %c0_11] : memref<12x96xf32, #tpu.memory_space<vmem>>, vector<1x64xf32>
    %c5 = arith.constant 5 : index
    %c0_12 = arith.constant 0 : index
    %11 = vector.load %arg5[%c5, %c0_12] : memref<12x96xf32, #tpu.memory_space<vmem>>, vector<1x32xf32>
    %c6 = arith.constant 6 : index
    %c0_13 = arith.constant 0 : index
    %12 = vector.load %arg5[%c6, %c0_13] : memref<12x96xf32, #tpu.memory_space<vmem>>, vector<1x32xf32>
    %c7 = arith.constant 7 : index
    %c0_14 = arith.constant 0 : index
    %13 = vector.load %arg5[%c7, %c0_14] : memref<12x96xf32, #tpu.memory_space<vmem>>, vector<1x32xf32>
    %c8 = arith.constant 8 : index
    %c0_15 = arith.constant 0 : index
    %14 = vector.load %arg5[%c8, %c0_15] : memref<12x96xf32, #tpu.memory_space<vmem>>, vector<1x32xf32>
    %c9 = arith.constant 9 : index
    %c0_16 = arith.constant 0 : index
    %15 = vector.load %arg5[%c9, %c0_16] : memref<12x96xf32, #tpu.memory_space<vmem>>, vector<1x32xf32>
    %c10 = arith.constant 10 : index
    %c0_17 = arith.constant 0 : index
    %16 = vector.load %arg5[%c10, %c0_17] : memref<12x96xf32, #tpu.memory_space<vmem>>, vector<1x32xf32>
    %c11 = arith.constant 11 : index
    %c0_18 = arith.constant 0 : index
    %17 = vector.load %arg5[%c11, %c0_18] : memref<12x96xf32, #tpu.memory_space<vmem>>, vector<1x32xf32>
    %c0_19 = arith.constant 0 : index
    %c0_20 = arith.constant 0 : index
    %c0_21 = arith.constant 0 : index
    %18 = vector.load %arg1[%c0_19, %c0_20, %c0_21] : memref<1x8x32xf32, #tpu.memory_space<vmem>>, vector<1x8x32xf32>
    %19 = vector.shape_cast %18 : vector<1x8x32xf32> to vector<8x32xf32>
    %c0_22 = arith.constant 0 : index
    %c0_23 = arith.constant 0 : index
    %c0_24 = arith.constant 0 : index
    %20 = vector.load %arg2[%c0_22, %c0_23, %c0_24] : memref<1x16x32xf32, #tpu.memory_space<vmem>>, vector<1x16x32xf32>
    %21 = vector.shape_cast %20 : vector<1x16x32xf32> to vector<16x32xf32>
    %c0_25 = arith.constant 0 : index
    %c0_26 = arith.constant 0 : index
    %22 = vector.load %arg3[%c0_25, %c0_26] : memref<8x8xf32, #tpu.memory_space<vmem>>, vector<8x8xf32>
    %23 = arith.truncf %19 : vector<8x32xf32> to vector<8x32xbf16>
    %cst = arith.constant dense<0.000000e+00> : vector<8x96xf32>
    %24 = tpu.matmul %23, %0, %cst {dimension_numbers = #tpu.dot_dimension_numbers<[1], [1], [0], [0], [0, 0, 1, 0], [], []>} : vector<8x32xbf16>, vector<96x32xbf16>, vector<8x96xf32> -> vector<8x96xf32>
    %25 = vector.broadcast %6 : vector<1x96xf32> to vector<8x96xf32>
    %26 = arith.addf %24, %25 : vector<8x96xf32>
    %27 = vector.extract_strided_slice %26 {offsets = [0, 0], sizes = [8, 32], strides = [1, 1]} : vector<8x96xf32> to vector<8x32xf32>
    %28 = vector.extract_strided_slice %26 {offsets = [0, 32], sizes = [8, 32], strides = [1, 1]} : vector<8x96xf32> to vector<8x32xf32>
    %29 = vector.extract_strided_slice %26 {offsets = [0, 64], sizes = [8, 32], strides = [1, 1]} : vector<8x96xf32> to vector<8x32xf32>
    %30 = vector.shape_cast %27 : vector<8x32xf32> to vector<8x4x8xf32>
    %31 = tpu.transpose %30, [1, 0, 2] : vector<8x4x8xf32> -> vector<4x8x8xf32>
    %32 = arith.truncf %31 : vector<4x8x8xf32> to vector<4x8x8xbf16>
    %33 = vector.shape_cast %28 : vector<8x32xf32> to vector<8x4x8xf32>
    %34 = tpu.transpose %33, [1, 0, 2] : vector<8x4x8xf32> -> vector<4x8x8xf32>
    %35 = arith.truncf %34 : vector<4x8x8xf32> to vector<4x8x8xbf16>
    %36 = vector.shape_cast %29 : vector<8x32xf32> to vector<8x4x8xf32>
    %37 = tpu.transpose %36, [1, 0, 2] : vector<8x4x8xf32> -> vector<4x8x8xf32>
    %38 = arith.truncf %37 : vector<4x8x8xf32> to vector<4x8x8xbf16>
    "tpu.trace_start"() <{level = 10 : i32, message = "hqe,hke->hqk"}> : () -> ()
    %cst_27 = arith.constant dense<0.000000e+00> : vector<4x8x8xf32>
    %39 = tpu.matmul %32, %35, %cst_27 {dimension_numbers = #tpu.dot_dimension_numbers<[2], [2], [1], [1], [0, 0, 0, 1, 1, 1], [0], [0]>} : vector<4x8x8xbf16>, vector<4x8x8xbf16>, vector<4x8x8xf32> -> vector<4x8x8xf32>
    "tpu.trace_stop"() : () -> ()
    %cst_28 = arith.constant 0.353553385 : f32
    %40 = vector.broadcast %cst_28 : f32 to vector<4x8x8xf32>
    %41 = arith.mulf %39, %40 : vector<4x8x8xf32>
    %42 = vector.shape_cast %22 : vector<8x8xf32> to vector<1x8x8xf32>
    %43 = vector.broadcast %42 : vector<1x8x8xf32> to vector<4x8x8xf32>
    %44 = arith.addf %41, %43 : vector<4x8x8xf32>
    %cst_29 = arith.constant dense<0xFF800000> : vector<4x8xf32>
    %45 = vector.multi_reduction <maximumf>, %44, %cst_29 [2] : vector<4x8x8xf32> to vector<4x8xf32>
    %46 = vector.shape_cast %45 : vector<4x8xf32> to vector<4x8x1xf32>
    %47 = vector.broadcast %46 : vector<4x8x1xf32> to vector<4x8x8xf32>
    %48 = arith.subf %44, %47 : vector<4x8x8xf32>
    %49 = math.exp %48 : vector<4x8x8xf32>
    %cst_30 = arith.constant dense<0.000000e+00> : vector<4x8xf32>
    %50 = vector.multi_reduction <add>, %49, %cst_30 [2] : vector<4x8x8xf32> to vector<4x8xf32>
    %51 = vector.shape_cast %50 : vector<4x8xf32> to vector<4x8x1xf32>
    %52 = tpu.reciprocal %51 {approx = true} : vector<4x8x1xf32> -> vector<4x8x1xf32>
    %53 = vector.broadcast %52 : vector<4x8x1xf32> to vector<4x8x8xf32>
    %54 = arith.mulf %49, %53 : vector<4x8x8xf32>
    %55 = arith.truncf %54 : vector<4x8x8xf32> to vector<4x8x8xbf16>
    "tpu.trace_start"() <{level = 10 : i32, message = "hqk,hke->hqe"}> : () -> ()
    %cst_31 = arith.constant dense<0.000000e+00> : vector<4x8x8xf32>
    %56 = tpu.matmul %55, %38, %cst_31 {dimension_numbers = #tpu.dot_dimension_numbers<[2], [1], [1], [2], [0, 0, 0, 1, 1, 2], [0], [0]>} : vector<4x8x8xbf16>, vector<4x8x8xbf16>, vector<4x8x8xf32> -> vector<4x8x8xf32>
    "tpu.trace_stop"() : () -> ()
    %57 = tpu.transpose %56, [1, 0, 2] : vector<4x8x8xf32> -> vector<8x4x8xf32>
    %58 = vector.shape_cast %57 : vector<8x4x8xf32> to vector<8x32xf32>
    %59 = arith.truncf %58 : vector<8x32xf32> to vector<8x32xbf16>
    %cst_32 = arith.constant dense<0.000000e+00> : vector<8x32xf32>
    %60 = tpu.matmul %59, %1, %cst_32 {dimension_numbers = #tpu.dot_dimension_numbers<[1], [1], [0], [0], [0, 0, 1, 0], [], []>} : vector<8x32xbf16>, vector<32x32xbf16>, vector<8x32xf32> -> vector<8x32xf32>
    %61 = vector.broadcast %7 : vector<1x32xf32> to vector<8x32xf32>
    %62 = arith.addf %60, %61 : vector<8x32xf32>
    %63 = arith.addf %19, %62 : vector<8x32xf32>
    %cst_33 = arith.constant dense<0.000000e+00> : vector<8xf32>
    %64 = vector.multi_reduction <add>, %63, %cst_33 [1] : vector<8x32xf32> to vector<8xf32>
    %65 = vector.shape_cast %64 : vector<8xf32> to vector<8x1xf32>
    %cst_34 = arith.constant 3.200000e+01 : f32
    %66 = vector.broadcast %cst_34 : f32 to vector<8x1xf32>
    %67 = arith.divf %65, %66 : vector<8x1xf32>
    %68 = vector.broadcast %67 : vector<8x1xf32> to vector<8x32xf32>
    %69 = arith.subf %63, %68 : vector<8x32xf32>
    %70 = arith.mulf %69, %69 : vector<8x32xf32>
    %cst_35 = arith.constant dense<0.000000e+00> : vector<8xf32>
    %71 = vector.multi_reduction <add>, %70, %cst_35 [1] : vector<8x32xf32> to vector<8xf32>
    %72 = vector.shape_cast %71 : vector<8xf32> to vector<8x1xf32>
    %cst_36 = arith.constant 3.200000e+01 : f32
    %73 = vector.broadcast %cst_36 : f32 to vector<8x1xf32>
    %74 = arith.divf %72, %73 : vector<8x1xf32>
    %75 = vector.broadcast %67 : vector<8x1xf32> to vector<8x32xf32>
    %76 = arith.subf %63, %75 : vector<8x32xf32>
    %cst_37 = arith.constant 9.99999974E-6 : f32
    %77 = vector.broadcast %cst_37 : f32 to vector<8x1xf32>
    %78 = arith.addf %74, %77 : vector<8x1xf32>
    %79 = math.rsqrt %78 : vector<8x1xf32>
    %80 = vector.broadcast %79 : vector<8x1xf32> to vector<8x32xf32>
    %81 = arith.mulf %76, %80 : vector<8x32xf32>
    %82 = vector.broadcast %12 : vector<1x32xf32> to vector<8x32xf32>
    %83 = arith.mulf %81, %82 : vector<8x32xf32>
    %84 = vector.broadcast %13 : vector<1x32xf32> to vector<8x32xf32>
    %85 = arith.addf %83, %84 : vector<8x32xf32>
    %86 = arith.truncf %85 : vector<8x32xf32> to vector<8x32xbf16>
    %87 = vector.extract_strided_slice %2 {offsets = [0, 0], sizes = [32, 32], strides = [1, 1]} : vector<96x32xbf16> to vector<32x32xbf16>
    %cst_38 = arith.constant dense<0.000000e+00> : vector<8x32xf32>
    %88 = tpu.matmul %86, %87, %cst_38 {dimension_numbers = #tpu.dot_dimension_numbers<[1], [1], [0], [0], [0, 0, 1, 0], [], []>} : vector<8x32xbf16>, vector<32x32xbf16>, vector<8x32xf32> -> vector<8x32xf32>
    %89 = vector.extract_strided_slice %8 {offsets = [0, 0], sizes = [1, 32], strides = [1, 1]} : vector<1x96xf32> to vector<1x32xf32>
    %90 = vector.broadcast %89 : vector<1x32xf32> to vector<8x32xf32>
    %91 = arith.addf %88, %90 : vector<8x32xf32>
    %92 = arith.truncf %21 : vector<16x32xf32> to vector<16x32xbf16>
    %93 = vector.extract_strided_slice %2 {offsets = [32, 0], sizes = [64, 32], strides = [1, 1]} : vector<96x32xbf16> to vector<64x32xbf16>
    %cst_39 = arith.constant dense<0.000000e+00> : vector<16x64xf32>
    %94 = tpu.matmul %92, %93, %cst_39 {dimension_numbers = #tpu.dot_dimension_numbers<[1], [1], [0], [0], [0, 0, 1, 0], [], []>} : vector<16x32xbf16>, vector<64x32xbf16>, vector<16x64xf32> -> vector<16x64xf32>
    %95 = vector.extract_strided_slice %8 {offsets = [0, 32], sizes = [1, 64], strides = [1, 1]} : vector<1x96xf32> to vector<1x64xf32>
    %96 = vector.broadcast %95 : vector<1x64xf32> to vector<16x64xf32>
    %97 = arith.addf %94, %96 : vector<16x64xf32>
    %98 = vector.extract_strided_slice %97 {offsets = [0, 0], sizes = [16, 32], strides = [1, 1]} : vector<16x64xf32> to vector<16x32xf32>
    %99 = vector.extract_strided_slice %97 {offsets = [0, 32], sizes = [16, 32], strides = [1, 1]} : vector<16x64xf32> to vector<16x32xf32>
    %100 = vector.shape_cast %91 : vector<8x32xf32> to vector<8x4x8xf32>
    %101 = tpu.transpose %100, [1, 0, 2] : vector<8x4x8xf32> -> vector<4x8x8xf32>
    %102 = arith.truncf %101 : vector<4x8x8xf32> to vector<4x8x8xbf16>
    %103 = vector.shape_cast %98 : vector<16x32xf32> to vector<16x4x8xf32>
    %104 = tpu.transpose %103, [1, 0, 2] : vector<16x4x8xf32> -> vector<4x16x8xf32>
    %105 = arith.truncf %104 : vector<4x16x8xf32> to vector<4x16x8xbf16>
    %106 = vector.shape_cast %99 : vector<16x32xf32> to vector<16x4x8xf32>
    %107 = tpu.transpose %106, [1, 0, 2] : vector<16x4x8xf32> -> vector<4x16x8xf32>
    %108 = arith.truncf %107 : vector<4x16x8xf32> to vector<4x16x8xbf16>
    "tpu.trace_start"() <{level = 10 : i32, message = "hqe,hke->hqk"}> : () -> ()
    %cst_40 = arith.constant dense<0.000000e+00> : vector<4x8x16xf32>
    %109 = tpu.matmul %102, %105, %cst_40 {dimension_numbers = #tpu.dot_dimension_numbers<[2], [2], [1], [1], [0, 0, 0, 1, 1, 1], [0], [0]>} : vector<4x8x8xbf16>, vector<4x16x8xbf16>, vector<4x8x16xf32> -> vector<4x8x16xf32>
    "tpu.trace_stop"() : () -> ()
    %cst_41 = arith.constant 0.353553385 : f32
    %110 = vector.broadcast %cst_41 : f32 to vector<4x8x16xf32>
    %111 = arith.mulf %109, %110 : vector<4x8x16xf32>
    %cst_42 = arith.constant dense<0xFF800000> : vector<4x8xf32>
    %112 = vector.multi_reduction <maximumf>, %111, %cst_42 [2] : vector<4x8x16xf32> to vector<4x8xf32>
    %113 = vector.shape_cast %112 : vector<4x8xf32> to vector<4x8x1xf32>
    %114 = vector.broadcast %113 : vector<4x8x1xf32> to vector<4x8x16xf32>
    %115 = arith.subf %111, %114 : vector<4x8x16xf32>
    %116 = math.exp %115 : vector<4x8x16xf32>
    %cst_43 = arith.constant dense<0.000000e+00> : vector<4x8xf32>
    %117 = vector.multi_reduction <add>, %116, %cst_43 [2] : vector<4x8x16xf32> to vector<4x8xf32>
    %118 = vector.shape_cast %117 : vector<4x8xf32> to vector<4x8x1xf32>
    %119 = tpu.reciprocal %118 {approx = true} : vector<4x8x1xf32> -> vector<4x8x1xf32>
    %120 = vector.broadcast %119 : vector<4x8x1xf32> to vector<4x8x16xf32>
    %121 = arith.mulf %116, %120 : vector<4x8x16xf32>
    %122 = arith.truncf %121 : vector<4x8x16xf32> to vector<4x8x16xbf16>
    "tpu.trace_start"() <{level = 10 : i32, message = "hqk,hke->hqe"}> : () -> ()
    %cst_44 = arith.constant dense<0.000000e+00> : vector<4x8x8xf32>
    %123 = tpu.matmul %122, %108, %cst_44 {dimension_numbers = #tpu.dot_dimension_numbers<[2], [1], [1], [2], [0, 0, 0, 1, 1, 2], [0], [0]>} : vector<4x8x16xbf16>, vector<4x16x8xbf16>, vector<4x8x8xf32> -> vector<4x8x8xf32>
    "tpu.trace_stop"() : () -> ()
    %124 = tpu.transpose %123, [1, 0, 2] : vector<4x8x8xf32> -> vector<8x4x8xf32>
    %125 = vector.shape_cast %124 : vector<8x4x8xf32> to vector<8x32xf32>
    %126 = arith.truncf %125 : vector<8x32xf32> to vector<8x32xbf16>
    %cst_45 = arith.constant dense<0.000000e+00> : vector<8x32xf32>
    %127 = tpu.matmul %126, %3, %cst_45 {dimension_numbers = #tpu.dot_dimension_numbers<[1], [1], [0], [0], [0, 0, 1, 0], [], []>} : vector<8x32xbf16>, vector<32x32xbf16>, vector<8x32xf32> -> vector<8x32xf32>
    %128 = vector.broadcast %9 : vector<1x32xf32> to vector<8x32xf32>
    %129 = arith.addf %127, %128 : vector<8x32xf32>
    %130 = arith.addf %85, %129 : vector<8x32xf32>
    %cst_46 = arith.constant dense<0.000000e+00> : vector<8xf32>
    %131 = vector.multi_reduction <add>, %130, %cst_46 [1] : vector<8x32xf32> to vector<8xf32>
    %132 = vector.shape_cast %131 : vector<8xf32> to vector<8x1xf32>
    %cst_47 = arith.constant 3.200000e+01 : f32
    %133 = vector.broadcast %cst_47 : f32 to vector<8x1xf32>
    %134 = arith.divf %132, %133 : vector<8x1xf32>
    %135 = vector.broadcast %134 : vector<8x1xf32> to vector<8x32xf32>
    %136 = arith.subf %130, %135 : vector<8x32xf32>
    %137 = arith.mulf %136, %136 : vector<8x32xf32>
    %cst_48 = arith.constant dense<0.000000e+00> : vector<8xf32>
    %138 = vector.multi_reduction <add>, %137, %cst_48 [1] : vector<8x32xf32> to vector<8xf32>
    %139 = vector.shape_cast %138 : vector<8xf32> to vector<8x1xf32>
    %cst_49 = arith.constant 3.200000e+01 : f32
    %140 = vector.broadcast %cst_49 : f32 to vector<8x1xf32>
    %141 = arith.divf %139, %140 : vector<8x1xf32>
    %142 = vector.broadcast %134 : vector<8x1xf32> to vector<8x32xf32>
    %143 = arith.subf %130, %142 : vector<8x32xf32>
    %cst_50 = arith.constant 9.99999974E-6 : f32
    %144 = vector.broadcast %cst_50 : f32 to vector<8x1xf32>
    %145 = arith.addf %141, %144 : vector<8x1xf32>
    %146 = math.rsqrt %145 : vector<8x1xf32>
    %147 = vector.broadcast %146 : vector<8x1xf32> to vector<8x32xf32>
    %148 = arith.mulf %143, %147 : vector<8x32xf32>
    %149 = vector.broadcast %14 : vector<1x32xf32> to vector<8x32xf32>
    %150 = arith.mulf %148, %149 : vector<8x32xf32>
    %151 = vector.broadcast %15 : vector<1x32xf32> to vector<8x32xf32>
    %152 = arith.addf %150, %151 : vector<8x32xf32>
    %153 = arith.truncf %152 : vector<8x32xf32> to vector<8x32xbf16>
    %cst_51 = arith.constant dense<0.000000e+00> : vector<8x64xf32>
    %154 = tpu.matmul %153, %4, %cst_51 {dimension_numbers = #tpu.dot_dimension_numbers<[1], [1], [0], [0], [0, 0, 1, 0], [], []>} : vector<8x32xbf16>, vector<64x32xbf16>, vector<8x64xf32> -> vector<8x64xf32>
    %155 = vector.broadcast %10 : vector<1x64xf32> to vector<8x64xf32>
    %156 = arith.addf %154, %155 : vector<8x64xf32>
    %cst_52 = arith.constant 0.000000e+00 : f32
    %157 = vector.broadcast %cst_52 : f32 to vector<8x64xf32>
    %158 = arith.maximumf %156, %157 : vector<8x64xf32>
    %159 = arith.truncf %158 : vector<8x64xf32> to vector<8x64xbf16>
    %cst_53 = arith.constant dense<0.000000e+00> : vector<8x32xf32>
    %160 = tpu.matmul %159, %5, %cst_53 {dimension_numbers = #tpu.dot_dimension_numbers<[1], [0], [0], [1], [0, 0, 1, 1], [], []>} : vector<8x64xbf16>, vector<64x32xbf16>, vector<8x32xf32> -> vector<8x32xf32>
    %161 = vector.broadcast %11 : vector<1x32xf32> to vector<8x32xf32>
    %162 = arith.addf %160, %161 : vector<8x32xf32>
    %163 = arith.addf %152, %162 : vector<8x32xf32>
    %cst_54 = arith.constant dense<0.000000e+00> : vector<8xf32>
    %164 = vector.multi_reduction <add>, %163, %cst_54 [1] : vector<8x32xf32> to vector<8xf32>
    %165 = vector.shape_cast %164 : vector<8xf32> to vector<8x1xf32>
    %cst_55 = arith.constant 3.200000e+01 : f32
    %166 = vector.broadcast %cst_55 : f32 to vector<8x1xf32>
    %167 = arith.divf %165, %166 : vector<8x1xf32>
    %168 = vector.broadcast %167 : vector<8x1xf32> to vector<8x32xf32>
    %169 = arith.subf %163, %168 : vector<8x32xf32>
    %170 = arith.mulf %169, %169 : vector<8x32xf32>
    %cst_56 = arith.constant dense<0.000000e+00> : vector<8xf32>
    %171 = vector.multi_reduction <add>, %170, %cst_56 [1] : vector<8x32xf32> to vector<8xf32>
    %172 = vector.shape_cast %171 : vector<8xf32> to vector<8x1xf32>
    %cst_57 = arith.constant 3.200000e+01 : f32
    %173 = vector.broadcast %cst_57 : f32 to vector<8x1xf32>
    %174 = arith.divf %172, %173 : vector<8x1xf32>
    %175 = vector.broadcast %167 : vector<8x1xf32> to vector<8x32xf32>
    %176 = arith.subf %163, %175 : vector<8x32xf32>
    %cst_58 = arith.constant 9.99999974E-6 : f32
    %177 = vector.broadcast %cst_58 : f32 to vector<8x1xf32>
    %178 = arith.addf %174, %177 : vector<8x1xf32>
    %179 = math.rsqrt %178 : vector<8x1xf32>
    %180 = vector.broadcast %179 : vector<8x1xf32> to vector<8x32xf32>
    %181 = arith.mulf %176, %180 : vector<8x32xf32>
    %182 = vector.broadcast %16 : vector<1x32xf32> to vector<8x32xf32>
    %183 = arith.mulf %181, %182 : vector<8x32xf32>
    %184 = vector.broadcast %17 : vector<1x32xf32> to vector<8x32xf32>
    %185 = arith.addf %183, %184 : vector<8x32xf32>
    %c0_59 = arith.constant 0 : index
    %c0_60 = arith.constant 0 : index
    %c0_61 = arith.constant 0 : index
    %186 = vector.load %arg6[%c0_59, %c0_60, %c0_61] : memref<1x8x32xf32, #tpu.memory_space<vmem>>, vector<1x8x32xf32>
    %187 = vector.shape_cast %186 : vector<1x8x32xf32> to vector<8x32xf32>
    %188 = vector.shape_cast %185 : vector<8x32xf32> to vector<1x8x32xf32>
    tpu.vector_store %arg6[%c0_59, %c0_60, %c0_61], %188 {strides = array<i32>} : memref<1x8x32xf32, #tpu.memory_space<vmem>>, vector<1x8x32xf32>,
    return
  }
  func.func @transform_0(%arg0: i32) -> (i32, i32, i32) {
    %c0_i32 = arith.constant 0 : i32
    %c0_i32_0 = arith.constant 0 : i32
    %c0_i32_1 = arith.constant 0 : i32
    return %arg0, %c0_i32, %c0_i32_0 : i32, i32, i32
  }
  func.func @transform_1(%arg0: i32) -> (i32, i32, i32) {
    %c0_i32 = arith.constant 0 : i32
    %c0_i32_0 = arith.constant 0 : i32
    %c0_i32_1 = arith.constant 0 : i32
    return %arg0, %c0_i32, %c0_i32_0 : i32, i32, i32
  }
  func.func @transform_2(%arg0: i32) -> (i32, i32) {
    %c0_i32 = arith.constant 0 : i32
    %c0_i32_0 = arith.constant 0 : i32
    %c0_i32_1 = arith.constant 0 : i32
    return %c0_i32, %c0_i32_0 : i32, i32
  }
  func.func @transform_3(%arg0: i32) -> (i32, i32) {
    %c0_i32 = arith.constant 0 : i32
    %c0_i32_0 = arith.constant 0 : i32
    %c0_i32_1 = arith.constant 0 : i32
    return %c0_i32, %c0_i32_0 : i32, i32
  }
  func.func @transform_4(%arg0: i32) -> (i32, i32) {
    %c0_i32 = arith.constant 0 : i32
    %c0_i32_0 = arith.constant 0 : i32
    %c0_i32_1 = arith.constant 0 : i32
    return %c0_i32, %c0_i32_0 : i32, i32
  }
  func.func @transform_5(%arg0: i32) -> (i32, i32, i32) {
    %c0_i32 = arith.constant 0 : i32
    %c0_i32_0 = arith.constant 0 : i32
    %c0_i32_1 = arith.constant 0 : i32
    return %arg0, %c0_i32, %c0_i32_0 : i32, i32, i32
  }
}

</mosaic_0001>

<bundles_post_ra>
// kernel: decoder_layer_forward.1
= control target key start
LH: loop header
LB: loop body
LE: loop exit
PB: predicated region body
PF: predicated region fallthrough
CT: control target
= control target key end

     0   :  { %s3764_s18 = smov 0   ;;  %s4401_s0 = inlined_call_operand.vmem [shape: f32[2,8,32], index: 0, kind: input, shape index: {}]   ;;  %s4402_s1 = inlined_call_operand.vmem [shape: f32[2,16,32], index: 1, kind: input, shape index: {}]   ;;  %s4403_s2 = inlined_call_operand.vmem [shape: f32[8,8], index: 2, kind: input, shape index: {}]   ;;  %s4404_s3 = inlined_call_operand.vmem [shape: bf16[384,32], index: 3, kind: input, shape index: {}]   ;;  %s4405_s4 = inlined_call_operand.vmem [shape: f32[12,96], index: 4, kind: input, shape index: {}]   ;;  %s4406_s5 = inlined_call_operand.vmem [shape: f32[2,8,32], index: 5, kind: output, shape index: {}]  }
   0x1 LB: > { %s3306_s19 = sadd.s32 4294967295, %s3720_s18   ;;  %p3310_p0 = scmp.ge.s32.totalorder %s3720_s18, 1  ;;  %s3720_s18 = sphi %s3764_s18, %s15_s18  }
   0x2   : > { %p196_p1 = scmp.lt.s32.totalorder %s3720_s18, 3 }
   0x4   : > { %p197_p2 = pnand %p3310_p0, %p196_p1 }
   0x5   : > { %v3652_v0 = vld [vmem:[%s4404_s3] sm:$0xff] (!%p197_p2)   ;;  %v3722_v1 = vmov (!%p197_p2), 0.0   ;;  %vm340_vm0 = vcmask (!%p197_p2), 261120   ;;  %v3653_v3 = vld [vmem:[%s4404_s3 + $0x8] sm:$0xff] (!%p197_p2)   ;;  %vm3723_vm1 = vmmov (!%p197_p2), 0   ;;  %v3654_v5 = vld [vmem:[%s4404_s3 + $0x10] sm:$0xff] (!%p197_p2)   ;;  %v417_v26 = vlaneseq (!%p197_p2) }
   0x6   : > { %200 = sbr.rel (%p197_p2) target bundleno = 4581 (0x11e5), region = 40  ;;  %3460 = vmatprep.subr.bf16.mxu0 (!%p197_p2), %v3722_v1  ;;  %3476 = vmatprep.subr.bf16.mxu1 (!%p197_p2), %v3722_v1  ;;  %v345_v2 = vsel (!%p197_p2), %vm340_vm0, %v3652_v0, 0  ;;  %v348_v4 = vsel (!%p197_p2), %vm340_vm0, %v3653_v3, 0  ;;  %v351_v6 = vsel (!%p197_p2), %vm340_vm0, %v3654_v5, 0  ;;  %v3655_v7 = vld [vmem:[%s4404_s3 + $0x18] sm:$0xff] (!%p197_p2)   ;;  %v3656_v9 = vld [vmem:[%s4404_s3 + $0x20] sm:$0xff] (!%p197_p2)  }
   0x7   : > { %3461 = vmatpush3.bf16.xpose.msra.mxu0 (!%p197_p2), %v345_v2  ;;  %3472 = vmatprep.mubr.msk.bf16.mxu0 (!%p197_p2), %vm3723_vm1, %v3722_v1  ;;  %v354_v8 = vsel (!%p197_p2), %vm340_vm0, %v3655_v7, 0  ;;  %p227_p3 = scmp.lt.s32.totalorder (!%p197_p2), %s3306_s19, 1  ;;  %v357_v10 = vsel (!%p197_p2), %vm340_vm0, %v3656_v9, 0  ;;  %v3657_v11 = vld [vmem:[%s4404_s3 + $0x28] sm:$0xff] (!%p197_p2)   ;;  %v3315_v15 = vld [vmem:[%s4405_s4] ss:$0 sm:$0xff] (!%p197_p2) }
   0x8   : > { %3462 = vmatprep.subr.bf16.mxu0 (!%p197_p2), %v3722_v1  ;;  %3478 = vmatprep.mubr.msk.bf16.mxu1 (!%p197_p2), %vm3723_vm1, %v3722_v1  ;;  %v360_v12 = vsel (!%p197_p2), %vm340_vm0, %v3657_v11, 0  ;;  %s3724_s13 = smov (!%p197_p2), 104   ;;  %s3725_s14 = smov (!%p197_p2), 120   ;;  %v3728_v24 = vmov (!%p197_p2), 1983009808   ;;  %v418_v28 = vshrl.u32 (!%p197_p2), %v417_v26, 7 }
   0x9   : > { %s3726_s15 = smov (!%p197_p2), 96   ;;  %s3727_s16 = smov (!%p197_p2), 112   ;;  %v415_v25 = vunpack.c.l.s4 (!%p197_p2), %v3728_v24  ;;  %v3729_v29 = vmov (!%p197_p2), 1934713408   ;;  %vm856_vm2 = vcmask (!%p197_p2), 64512   ;;  %vm1100_vm3 = vcmask (!%p197_p2), 1043456  }
   0xa   : > { %v447_v30 = vunpack.c.l.s4 (!%p197_p2), %v3729_v29  ;;  %s3730_s21 = smov (!%p197_p2), 64   ;;  %s3731_s26 = smov (!%p197_p2), 16   ;;  %vm1431_vm4 = vcmask (!%p197_p2), 130048   ;;  %vm1433_vm5 = vcmask (!%p197_p2), 195584   ;;  %vm3172_vm6 = vcmask (!%p197_p2), 523264  }
   0xb   : > { %v416_v27 = vunpack.c.0.s8 (!%p197_p2), %v415_v25  ;;  %s3732_s27 = smov (!%p197_p2), 8   ;;  %s3733_s28 = smov (!%p197_p2), 24  }
   0xc   : > { %v448_v36 = vunpack.c.0.s8 (!%p197_p2), %v447_v30 }
   0xd   : > { %s4408_s19 = smov (!%p227_p3, %s3306_s19), 1  ;;  %v3856_v33 = vsub.s32 %v416_v27, %v418_v28 }
   0xe   : > { %s3311_s7 = sshll.u32 %s4408_s19, 3  ;;  %v3866_v43 = vsub.s32 %v448_v36, %v418_v28  ;;  %s3396_s23 = sshll.u32 %s4408_s19, 4 }
   0xf   : > { %3463 = vmatpush3.bf16.xpose.msra.mxu0 %v348_v4  ;;  %s230_s10 = scalar_lea.vmem %s4401_s0, %s3311_s7  ;;  %s235_s29 = scalar_lea.vmem %s4402_s1, %s3396_s23 }
  0x10   : > { %3464 = vmatprep.subr.bf16.mxu0 %v3722_v1  ;;  %v3819_v13 = vld [vmem:[%s230_s10] sm:$0xff]  ;;  %s239_s30 = scalar_lea.vmem %s4406_s5, %s3311_s7 }
  0x11   : > { %v305_v14 = vpack.c.bf16 %v3819_v13, %v3819_v13 }
  0x17   : > { %3465 = vmatpush3.bf16.xpose.msra.mxu0 %v351_v6 }
  0x18   : > { %3466 = vmatprep.subr.bf16.mxu0 %v3722_v1 }
  0x1f   : > { %3467 = vmatpush3.bf16.xpose.msra.mxu0 %v354_v8 }
  0x20   : > { %3468 = vmatprep.subr.bf16.mxu0 %v3722_v1 }
  0x27   : > { %3469 = vmatpush3.bf16.xpose.msra.mxu0 %v357_v10 }
  0x28   : > { %3470 = vmatprep.subr.bf16.mxu0 %v3722_v1 }
  0x2f   : > { %3471 = vmatpush3.bf16.xpose.msra.mxu0 %v360_v12 }
  0x30   : > { %3512 = vmatprep.subr.bf16.mxu0 %v3722_v1 }
  0x36   : > { %3473 = vmatmul.mubr.msk.bf16.vlgmr.msra.gmra.mrb[0].mxu0 %vm340_vm0, %v305_v14 }
  0x37   : > { %3514 = vmatprep.mubr.msk.bf16.mxu0 %vm3723_vm1, %v3722_v1 }
 0x109   : > { %v396_v16 = vpop.f32.mrb[0].mxu0 }
 0x10a   : > { %v3830_v17 = vadd.f32 %v3315_v15, %v396_v16  ;;  %v3474_v18 = vpop.f32.mrb[1].mxu0 }
 0x10b   : > { %v399_v19 = vpop.f32.mrb[2].mxu0 }
 0x10c   : > { %409 = vrot.lane.b32.xlu1 %v3830_v17, %s3724_s13  ;;  %403 = vrot.lane.b32.xlu0 %v3830_v17, %s3725_s14  ;;  %v3475_v20 = vpop.f32.mrb[3].mxu0 }
 0x110   : > { %552 = vrot.lane.b32.xlu1 %v3830_v17, %s3726_s15  ;;  %406 = vrot.lane.b32.xlu0 %v3830_v17, %s3727_s16 }
 0x17e   : > { %v3840_v21 = vpop.permute.xlu0 %403  ;;  %v3844_v22 = vpop.permute.xlu1 %409 }
 0x17f   : > { %554 = vrot.lane.b32.xlu0 %v3840_v21, %s3726_s15  ;;  %v428_v34 = vcombine.low %v3840_v21, %v3844_v22  ;;  %v429_v35 = vcombine.high %v3840_v21, %v3844_v22 }
 0x181   : > { %v436_v39 = vrot.slane %v428_v34, %v3856_v33  ;;  %v443_v40 = vrot.slane %v429_v35, %v3856_v33 }
 0x182   : > { %v3846_v23 = vpop.permute.xlu0 %406  ;;  %v553_v41 = vpop.permute.xlu1 %552 }
 0x183   : > { %558 = vrot.lane.b32.xlu0 %v3844_v22, %s3726_s15  ;;  %556 = vrot.lane.b32.xlu1 %v3846_v23, %s3726_s15  ;;  %v412_v31 = vcombine.low %v3830_v17, %v3846_v23  ;;  %v413_v32 = vcombine.high %v3830_v17, %v3846_v23 }
 0x185   : > { %v420_v37 = vrot.slane %v412_v31, %v3856_v33  ;;  %v427_v38 = vrot.slane %v413_v32, %v3856_v33 }
 0x187   : > { %v444_v44 = vcombine.low %v420_v37, %v436_v39  ;;  %v445_v45 = vcombine.high %v420_v37, %v436_v39  ;;  %v460_v46 = vcombine.low %v427_v38, %v443_v40  ;;  %v461_v47 = vcombine.high %v427_v38, %v443_v40 }
 0x189   : > { %v452_v54 = vrot.slane %v444_v44, %v3866_v43  ;;  %v459_v55 = vrot.slane %v445_v45, %v3866_v43  ;;  %v468_v56 = vrot.slane %v460_v46, %v3866_v43  ;;  %v475_v57 = vrot.slane %v461_v47, %v3866_v43 }
 0x18b   : > { %v480_v3 = vcombine.low %v452_v54, %v459_v55  ;;  %v3323_v4 = vcombine.high %v452_v54, %v459_v55  ;;  %v496_v5 = vcombine.low %v468_v56, %v475_v57  ;;  %v3324_v6 = vcombine.high %v468_v56, %v475_v57 }
 0x18d   : > { %v487_v16 = vrot.slane %v480_v3, %v3856_v33  ;;  %v495_v18 = vrot.slane %v3323_v4, %v3856_v33  ;;  %v503_v19 = vrot.slane %v496_v5, %v3856_v33  ;;  %v511_v20 = vrot.slane %v3324_v6, %v3856_v33  ;;  %v304_v4 = vld [vmem:[%s4403_s2] sm:$0xff] }
 0x18f   : > { %v512_v32 = vcombine.low %v487_v16, %v495_v18  ;;  %v528_v34 = vcombine.low %v503_v19, %v511_v20 }
 0x191   : > { %v520_v37 = vrot.slane %v512_v32, %v3866_v43  ;;  %v536_v38 = vrot.slane %v528_v34, %v3866_v43 }
 0x193   : > { %v544_v44 = vcombine.low %v520_v37, %v536_v38 }
 0x1f1   : > { %v555_v42 = vpop.permute.xlu0 %554 }
 0x1f5   : > { %v557_v48 = vpop.permute.xlu1 %556  ;;  %v559_v49 = vpop.permute.xlu0 %558 }
 0x1f6   : > { %v564_v50 = vcombine.low %v553_v41, %v557_v48  ;;  %v565_v51 = vcombine.high %v553_v41, %v557_v48  ;;  %v580_v52 = vcombine.low %v555_v42, %v559_v49  ;;  %v581_v53 = vcombine.high %v555_v42, %v559_v49 }
 0x1f7   : > { %v548_v48 = vpack.c.bf16 %v544_v44, %v544_v44 }
 0x1f8   : > { %v572_v58 = vrot.slane %v564_v50, %v3856_v33  ;;  %v579_v59 = vrot.slane %v565_v51, %v3856_v33  ;;  %v588_v60 = vrot.slane %v580_v52, %v3856_v33  ;;  %v595_v61 = vrot.slane %v581_v53, %v3856_v33 }
 0x1f9   : > { %v513_v51 = vcombine.high %v487_v16, %v495_v18  ;;  %v529_v52 = vcombine.high %v503_v19, %v511_v20  ;;  %v545_v53 = vcombine.high %v520_v37, %v536_v38 }
 0x1fa   : > { %v596_v62 = vcombine.low %v572_v58, %v588_v60  ;;  %v597_v63 = vcombine.high %v572_v58, %v588_v60  ;;  %v612_v0 = vcombine.low %v579_v59, %v595_v61  ;;  %v613_v2 = vcombine.high %v579_v59, %v595_v61 }
 0x1fb   : > { %v549_v55 = vpack.c.bf16 %v545_v53, %v545_v53  ;;  %v527_v56 = vrot.slane %v513_v51, %v3866_v43  ;;  %v543_v57 = vrot.slane %v529_v52, %v3866_v43 }
 0x1fc   : > { %v604_v7 = vrot.slane %v596_v62, %v3866_v43  ;;  %v611_v8 = vrot.slane %v597_v63, %v3866_v43  ;;  %v620_v9 = vrot.slane %v612_v0, %v3866_v43  ;;  %v627_v10 = vrot.slane %v613_v2, %v3866_v43 }
 0x1fd   : > { %v546_v60 = vcombine.low %v527_v56, %v543_v57  ;;  %v547_v0 = vcombine.high %v527_v56, %v543_v57 }
 0x1fe   : > { %v632_v11 = vcombine.low %v604_v7, %v611_v8  ;;  %v3325_v12 = vcombine.high %v604_v7, %v611_v8  ;;  %v648_v14 = vcombine.low %v620_v9, %v627_v10  ;;  %v3326_v15 = vcombine.high %v620_v9, %v627_v10 }
 0x1ff   : > { %v550_v62 = vpack.c.bf16 %v546_v60, %v546_v60  ;;  %v551_v2 = vpack.c.bf16 %v547_v0, %v547_v0 }
 0x200   : > { %v639_v24 = vrot.slane %v632_v11, %v3856_v33  ;;  %v647_v25 = vrot.slane %v3325_v12, %v3856_v33  ;;  %v655_v26 = vrot.slane %v648_v14, %v3856_v33  ;;  %v663_v27 = vrot.slane %v3326_v15, %v3856_v33 }
 0x202   : > { %v664_v28 = vcombine.low %v639_v24, %v647_v25  ;;  %v680_v29 = vcombine.low %v655_v26, %v663_v27  ;;  %v665_v41 = vcombine.high %v639_v24, %v647_v25  ;;  %v681_v42 = vcombine.high %v655_v26, %v663_v27 }
 0x204   : > { %v672_v30 = vrot.slane %v664_v28, %v3866_v43  ;;  %v688_v31 = vrot.slane %v680_v29, %v3866_v43  ;;  %v679_v46 = vrot.slane %v665_v41, %v3866_v43  ;;  %v695_v47 = vrot.slane %v681_v42, %v3866_v43 }
 0x206   : > { %v696_v35 = vcombine.low %v672_v30, %v688_v31  ;;  %v697_v40 = vcombine.high %v672_v30, %v688_v31  ;;  %v698_v50 = vcombine.low %v679_v46, %v695_v47  ;;  %v699_v59 = vcombine.high %v679_v46, %v695_v47 }
 0x208   : > { %v700_v36 = vpack.c.bf16 %v696_v35, %v696_v35  ;;  %v701_v45 = vpack.c.bf16 %v697_v40, %v697_v40  ;;  %v702_v54 = vpack.c.bf16 %v698_v50, %v698_v50  ;;  %v703_v61 = vpack.c.bf16 %v699_v59, %v699_v59 }
 0x20a   : > { %v861_v39 = vsel %vm856_vm2, %v700_v36, 0  ;;  %v907_v49 = vsel %vm856_vm2, %v701_v45, 0  ;;  %v953_v58 = vsel %vm856_vm2, %v702_v54, 0  ;;  %v999_v63 = vsel %vm856_vm2, %v703_v61, 0 }
 0x20b   : > { %3477 = vmatpush3.bf16.xpose.msra.mxu1 %v861_v39 }
 0x20c   : > { %3482 = vmatprep.subr.bf16.mxu1 %v3722_v1 }
 0x212   : > { %3479 = vmatmul.mubr.msk.bf16.vlgmr.msra.gmra.mrb[0].mxu1 %vm856_vm2, %v548_v48 }
 0x213   : > { %3483 = vmatpush3.bf16.xpose.msra.mxu1 %v907_v49  ;;  %3484 = vmatprep.mubr.msk.bf16.mxu1 %vm3723_vm1, %v3722_v1 }
 0x214   : > { %3488 = vmatprep.subr.bf16.mxu1 %v3722_v1 }
 0x21a   : > { %3485 = vmatmul.mubr.msk.bf16.vlgmr.msra.gmra.mrb[4].mxu1 %vm856_vm2, %v549_v55 }
 0x21b   : > { %3489 = vmatpush3.bf16.xpose.msra.mxu1 %v953_v58  ;;  %3490 = vmatprep.mubr.msk.bf16.mxu1 %vm3723_vm1, %v3722_v1 }
 0x21c   : > { %3494 = vmatprep.subr.bf16.mxu1 %v3722_v1 }
 0x222   : > { %3491 = vmatmul.mubr.msk.bf16.vlgmr.msra.gmra.mrb[8].mxu1 %vm856_vm2, %v550_v62 }
 0x223   : > { %3495 = vmatpush3.bf16.xpose.msra.mxu1 %v999_v63  ;;  %3496 = vmatprep.mubr.msk.bf16.mxu1 %vm3723_vm1, %v3722_v1 }
 0x224   : > { %3500 = vmatprep.subr.bf16.mxu1 %v3722_v1 }
 0x22a   : > { %3497 = vmatmul.mubr.msk.bf16.vlgmr.msra.gmra.mrb[12].mxu1 %vm856_vm2, %v551_v2 }
 0x22b   : > { %3502 = vmatprep.mubr.msk.bf16.mxu1 %vm3723_vm1, %v3722_v1 }
 0x2e5   : > { %v897_v3 = vpop.f32.mrb[0].mxu1 }
 0x2e6   : > { %v1041_v5 = vmul.f32 0.35355338, %v897_v3  ;;  %v3480_v6 = vpop.f32.mrb[1].mxu1 }
 0x2e7   : > { %v900_v7 = vpop.f32.mrb[2].mxu1 }
 0x2e8   : > { %v3481_v8 = vpop.f32.mrb[3].mxu1  ;;  %v1045_v9 = vadd.f32 %v1041_v5, %v304_v4 }
 0x2ea   : > { %v1049_v10 = vsel %vm856_vm2, %v1045_v9, -inf }
 0x2eb   : > { %1050 = vmax.xlane.f32.xlu1 %v1049_v10 }
 0x2ed   : > { %v943_v11 = vpop.f32.mrb[4].mxu1 }
 0x2ee   : > { %v1042_v12 = vmul.f32 0.35355338, %v943_v11  ;;  %v3486_v14 = vpop.f32.mrb[5].mxu1 }
 0x2ef   : > { %v946_v15 = vpop.f32.mrb[6].mxu1 }
 0x2f0   : > { %v3487_v16 = vpop.f32.mrb[7].mxu1  ;;  %v1046_v18 = vadd.f32 %v1042_v12, %v304_v4 }
 0x2f2   : > { %v1052_v19 = vsel %vm856_vm2, %v1046_v18, -inf }
 0x2f3   : > { %1053 = vmax.xlane.f32.xlu0 %v1052_v19 }
 0x2f5   : > { %v989_v20 = vpop.f32.mrb[8].mxu1 }
 0x2f6   : > { %v1043_v24 = vmul.f32 0.35355338, %v989_v20  ;;  %v3492_v25 = vpop.f32.mrb[9].mxu1 }
 0x2f7   : > { %v992_v26 = vpop.f32.mrb[10].mxu1 }
 0x2f8   : > { %v3493_v27 = vpop.f32.mrb[11].mxu1  ;;  %v1047_v28 = vadd.f32 %v1043_v24, %v304_v4 }
 0x2fa   : > { %v1055_v29 = vsel %vm856_vm2, %v1047_v28, -inf }
 0x2fb   : > { %1056 = vmax.xlane.f32.xlu0 %v1055_v29 }
 0x2fd   : > { %v1035_v30 = vpop.f32.mrb[12].mxu1 }
 0x2fe   : > { %v1044_v31 = vmul.f32 0.35355338, %v1035_v30  ;;  %v3498_v32 = vpop.f32.mrb[13].mxu1 }
 0x2ff   : > { %v1038_v34 = vpop.f32.mrb[14].mxu1 }
 0x300   : > { %v3499_v35 = vpop.f32.mrb[15].mxu1  ;;  %v1048_v36 = vadd.f32 %v1044_v31, %v304_v4 }
 0x302   : > { %v1058_v37 = vsel %vm856_vm2, %v1048_v36, -inf }
 0x303   : > { %1059 = vmax.xlane.f32.xlu1 %v1058_v37 }
 0x314   : > { %704 = vrot.lane.b32.xlu1 %v3830_v17, %s3730_s21 }
 0x318   : > { %708 = vrot.lane.b32.xlu1 %v3846_v23, %s3730_s21 }
 0x31c   : > { %710 = vrot.lane.b32.xlu1 %v3844_v22, %s3730_s21 }
 0x378   : > { %v1051_v38 = vpop.xlane.xlu1 %1050 }
 0x379   : > { %v1061_v39 = vsub.f32 %v1045_v9, %v1051_v38 }
 0x37b   : > { %v1065_v40 = vmul.f32 1.442695, %v1061_v39 }
 0x37d   : > { %3676 = vpow2.f32 %v1065_v40 }
 0x380   : > { %v1054_v41 = vpop.xlane.xlu0 %1053 }
 0x381   : > { %v1062_v23 = vsub.f32 %v1046_v18, %v1054_v41 }
 0x383   : > { %v1067_v49 = vmul.f32 1.442695, %v1062_v23 }
 0x387   : > { %v3926_v42 = vpop.eup %3676 }
 0x388   : > { %v1057_v44 = vpop.xlane.xlu0 %1056  ;;  %v1073_v45 = vsel %vm856_vm2, %v3926_v42, 0.0 }
 0x389   : > { %v1063_v46 = vsub.f32 %v1047_v28, %v1057_v44  ;;  %1074 = vadd.xlane.f32.xlu0 %v1073_v45 }
 0x38b   : > { %v1069_v47 = vmul.f32 1.442695, %v1063_v46 }
 0x38d   : > { %3678 = vpow2.f32 %v1069_v47 }
 0x38e   : > { %3680 = vpow2.f32 %v1067_v49 }
 0x390   : > { %v1060_v48 = vpop.xlane.xlu1 %1059 }
 0x391   : > { %v1064_v50 = vsub.f32 %v1048_v36, %v1060_v48 }
 0x393   : > { %v1071_v51 = vmul.f32 1.442695, %v1064_v50 }
 0x395   : > { %3682 = vpow2.f32 %v1071_v51 }
 0x397   : > { %v3930_v17 = vpop.eup %3678 }
 0x398   : > { %v1079_v22 = vsel %vm856_vm2, %v3930_v17, 0.0  ;;  %v3935_v52 = vpop.eup %3680 }
 0x399   : > { %1080 = vadd.xlane.f32.xlu1 %v1079_v22  ;;  %v1076_v53 = vsel %vm856_vm2, %v3935_v52, 0.0 }
 0x39f   : > { %706 = vrot.lane.b32.xlu0 %v3840_v21, %s3730_s21  ;;  %v3939_v54 = vpop.eup %3682  ;;  %v705_v21 = vpop.permute.xlu1 %704 }
 0x3a0   : > { %v1082_v55 = vsel %vm856_vm2, %v3939_v54, 0.0 }
 0x3a3   : > { %v709_v56 = vpop.permute.xlu1 %708 }
 0x3a4   : > { %v716_v58 = vcombine.low %v705_v21, %v709_v56  ;;  %v717_v59 = vcombine.high %v705_v21, %v709_v56 }
 0x3a6   : > { %v724_v0 = vrot.slane %v716_v58, %v3856_v33  ;;  %v731_v2 = vrot.slane %v717_v59, %v3856_v33 }
 0x3a7   : > { %v711_v60 = vpop.permute.xlu1 %710 }
 0x3be   : > { %1077 = vadd.xlane.f32.xlu0 %v1076_v53 }
 0x3c2   : > { %1083 = vadd.xlane.f32.xlu0 %v1082_v55 }
 0x416   : > { %v1075_v57 = vpop.xlane.xlu0 %1074 }
 0x417   : > { %3684 = vrcp.f32 %v1075_v57 }
 0x41a   : > { %v707_v61 = vpop.permute.xlu0 %706 }
 0x41b   : > { %v732_v62 = vcombine.low %v707_v61, %v711_v60  ;;  %v733_v63 = vcombine.high %v707_v61, %v711_v60 }
 0x41d   : > { %v740_v3 = vrot.slane %v732_v62, %v3856_v33  ;;  %v747_v4 = vrot.slane %v733_v63, %v3856_v33 }
 0x41f   : > { %v748_v5 = vcombine.low %v724_v0, %v740_v3  ;;  %v749_v6 = vcombine.high %v724_v0, %v740_v3  ;;  %v764_v7 = vcombine.low %v731_v2, %v747_v4  ;;  %v765_v8 = vcombine.high %v731_v2, %v747_v4 }
 0x421   : > { %v756_v9 = vrot.slane %v748_v5, %v3866_v43  ;;  %v763_v10 = vrot.slane %v749_v6, %v3866_v43  ;;  %v772_v11 = vrot.slane %v764_v7, %v3866_v43  ;;  %v779_v12 = vrot.slane %v765_v8, %v3866_v43  ;;  %v3685_v35 = vpop.eup %3684 }
 0x422   : > { %v1089_v40 = vmul.f32 %v3685_v35, %v3926_v42 }
 0x423   : > { %v784_v14 = vcombine.low %v756_v9, %v763_v10  ;;  %v3327_v15 = vcombine.high %v756_v9, %v763_v10  ;;  %v800_v16 = vcombine.low %v772_v11, %v779_v12  ;;  %v3328_v18 = vcombine.high %v772_v11, %v779_v12 }
 0x424   : > { %v1093_v23 = vpack.c.bf16 %v1089_v40, %v1089_v40 }
 0x425   : > { %v791_v19 = vrot.slane %v784_v14, %v3856_v33  ;;  %v799_v20 = vrot.slane %v3327_v15, %v3856_v33  ;;  %v807_v24 = vrot.slane %v800_v16, %v3856_v33  ;;  %v815_v25 = vrot.slane %v3328_v18, %v3856_v33 }
 0x426   : > { %v1081_v26 = vpop.xlane.xlu1 %1080 }
 0x427   : > { %3686 = vrcp.f32 %v1081_v26  ;;  %v816_v27 = vcombine.low %v791_v19, %v799_v20  ;;  %v832_v28 = vcombine.low %v807_v24, %v815_v25  ;;  %v817_v29 = vcombine.high %v791_v19, %v799_v20 }
 0x428   : > { %v833_v30 = vcombine.high %v807_v24, %v815_v25 }
 0x429   : > { %v824_v31 = vrot.slane %v816_v27, %v3866_v43  ;;  %v840_v32 = vrot.slane %v832_v28, %v3866_v43  ;;  %v831_v34 = vrot.slane %v817_v29, %v3866_v43  ;;  %v3659_v27 = vld [vmem:[%s4404_s3 + $0x38] sm:$0xff]  }
 0x42a   : > { %v847_v36 = vrot.slane %v833_v30, %v3866_v43 }
 0x42b   : > { %v848_v37 = vcombine.low %v824_v31, %v840_v32  ;;  %v849_v38 = vcombine.high %v824_v31, %v840_v32  ;;  %v1457_v32 = vsel %vm340_vm0, %v3659_v27, 0 }
 0x42c   : > { %v850_v39 = vcombine.low %v831_v34, %v847_v36  ;;  %v851_v51 = vcombine.high %v831_v34, %v847_v36 }
 0x42d   : > { %v852_v41 = vpack.c.bf16 %v848_v37, %v848_v37  ;;  %v853_v46 = vpack.c.bf16 %v849_v38, %v849_v38 }
 0x42e   : > { %v854_v44 = vpack.c.bf16 %v850_v39, %v850_v39  ;;  %v855_v21 = vpack.c.bf16 %v851_v51, %v851_v51 }
 0x42f   : > { %v1102_v45 = vsel %vm1100_vm3, %v852_v41, 0  ;;  %v1148_v42 = vsel %vm1100_vm3, %v853_v46, 0 }
 0x430   : > { %3501 = vmatpush3.bf16.msra.mxu1 %v1102_v45  ;;  %v1194_v47 = vsel %vm1100_vm3, %v854_v44, 0  ;;  %v1240_v58 = vsel %vm1100_vm3, %v855_v21, 0 }
 0x431   : > { %v3687_v22 = vpop.eup %3686  ;;  %3513 = vmatpush3.bf16.msra.mxu0 %v1194_v47  ;;  %3506 = vmatprep.subr.bf16.mxu1 %v3722_v1 }
 0x432   : > { %v1091_v48 = vmul.f32 %v3687_v22, %v3930_v17  ;;  %3524 = vmatprep.subr.bf16.mxu0 %v3722_v1 }
 0x433   : > { %3503 = vmatmul.mubr.msk.bf16.vlgmr.msra.gmra.mrb[16].mxu1 %vm856_vm2, %v1093_v23 }
 0x434   : > { %3507 = vmatpush3.bf16.msra.mxu1 %v1148_v42  ;;  %v1095_v49 = vpack.c.bf16 %v1091_v48, %v1091_v48  ;;  %3508 = vmatprep.mubr.msk.bf16.mxu1 %vm3723_vm1, %v3722_v1 }
 0x435   : > { %3518 = vmatprep.subr.bf16.mxu1 %v3722_v1 }
 0x436   : > { %3515 = vmatmul.mubr.msk.bf16.vlgmr.msra.gmra.mrb[4].mxu0 %vm856_vm2, %v1095_v49 }
 0x437   : > { %3528 = vmatprep.mubr.msk.bf16.mxu0 %vm3723_vm1, %v3722_v1 }
 0x44b   : > { %v1078_v50 = vpop.xlane.xlu0 %1077 }
 0x44c   : > { %3688 = vrcp.f32 %v1078_v50 }
 0x44f   : > { %v1084_v17 = vpop.xlane.xlu0 %1083 }
 0x450   : > { %3690 = vrcp.f32 %v1084_v17 }
 0x456   : > { %v3689_v53 = vpop.eup %3688 }
 0x457   : > { %v1090_v55 = vmul.f32 %v3689_v53, %v3935_v52  ;;  %v3658_v52 = vld [vmem:[%s4404_s3 + $0x30] sm:$0xff]  }
 0x458   : > { %v1454_v61 = vsel %vm340_vm0, %v3658_v52, 0 }
 0x459   : > { %v1094_v56 = vpack.c.bf16 %v1090_v55, %v1090_v55  ;;  %3525 = vmatpush3.bf16.xpose.msra.mxu0 %v1454_v61 }
 0x45a   : > { %v3691_v57 = vpop.eup %3690  ;;  %3526 = vmatprep.subr.bf16.mxu0 %v3722_v1 }
 0x45b   : > { %3509 = vmatmul.mubr.msk.bf16.vlgmr.msra.gmra.mrb[20].mxu1 %vm856_vm2, %v1094_v56  ;;  %v1092_v59 = vmul.f32 %v3691_v57, %v3939_v54 }
 0x45c   : > { %3519 = vmatpush3.bf16.msra.mxu1 %v1240_v58  ;;  %3520 = vmatprep.mubr.msk.bf16.mxu1 %vm3723_vm1, %v3722_v1 }
 0x45d   : > { %3532 = vmatprep.subr.bf16.mxu1 %v3722_v1  ;;  %v1096_v60 = vpack.c.bf16 %v1092_v59, %v1092_v59 }
 0x461   : > { %3527 = vmatpush3.bf16.xpose.msra.mxu0 %v1457_v32 }
 0x462   : > { %3540 = vmatprep.subr.bf16.mxu0 %v3722_v1 }
 0x463   : > { %3521 = vmatmul.mubr.msk.bf16.vlgmr.msra.gmra.mrb[24].mxu1 %vm856_vm2, %v1096_v60 }
 0x464   : > { %3536 = vmatprep.mubr.msk.bf16.mxu1 %vm3723_vm1, %v3722_v1 }
 0x506   : > { %v1138_v62 = vpop.f32.mrb[16].mxu1 }
 0x507   : > { %v3504_v63 = vpop.f32.mrb[17].mxu1 }
 0x508   : > { %v1141_v54 = vpop.f32.mrb[18].mxu1  ;;  %v3339_v63 = vld [vmem:[%s4405_s4 + $0x1] ss:$0 sm:$0xff] }
 0x509   : > { %v3505_v0 = vpop.f32.mrb[19].mxu1  ;;  %v1230_v2 = vpop.f32.mrb[4].mxu0 }
 0x50a   : > { %v1282_v3 = vcombine.low %v1138_v62, %v1230_v2  ;;  %v1283_v4 = vcombine.high %v1138_v62, %v1230_v2  ;;  %v3516_v5 = vpop.f32.mrb[5].mxu0 }
 0x50b   : > { %v1233_v6 = vpop.f32.mrb[6].mxu0 }
 0x50c   : > { %v3517_v7 = vpop.f32.mrb[7].mxu0  ;;  %v1290_v19 = vrot.slane %v1282_v3, %v3856_v33  ;;  %v1297_v20 = vrot.slane %v1283_v4, %v3856_v33 }
 0x50d   : > { %v3660_v7 = vld [vmem:[%s4404_s3 + $0x50] sm:$0xff]  }
 0x52e   : > { %v1184_v8 = vpop.f32.mrb[20].mxu1 }
 0x52f   : > { %v3510_v9 = vpop.f32.mrb[21].mxu1 }
 0x530   : > { %v1187_v10 = vpop.f32.mrb[22].mxu1  ;;  %v3661_v9 = vld [vmem:[%s4404_s3 + $0x58] sm:$0xff]  }
 0x531   : > { %v3511_v11 = vpop.f32.mrb[23].mxu1  ;;  %v1620_v10 = vsel %vm340_vm0, %v3661_v9, 0 }
 0x532   : > { %v3662_v11 = vld [vmem:[%s4404_s3 + $0x60] sm:$0xff]  }
 0x536   : > { %v1276_v12 = vpop.f32.mrb[24].mxu1 }
 0x537   : > { %v1298_v14 = vcombine.low %v1184_v8, %v1276_v12  ;;  %v1299_v15 = vcombine.high %v1184_v8, %v1276_v12  ;;  %v3522_v16 = vpop.f32.mrb[25].mxu1  ;;  %v1617_v8 = vsel %vm340_vm0, %v3660_v7, 0  ;;  %v1623_v12 = vsel %vm340_vm0, %v3662_v11, 0 }
 0x538   : > { %v1279_v18 = vpop.f32.mrb[26].mxu1  ;;  %v302_v16 = vld [vmem:[%s235_s29] sm:$0xff] }
 0x539   : > { %v1306_v24 = vrot.slane %v1298_v14, %v3856_v33  ;;  %v1313_v25 = vrot.slane %v1299_v15, %v3856_v33  ;;  %v3523_v26 = vpop.f32.mrb[27].mxu1  ;;  %v3663_v14 = vld [vmem:[%s4404_s3 + $0x68] sm:$0xff]  }
 0x53a   : > { %v1626_v15 = vsel %vm340_vm0, %v3663_v14, 0  ;;  %v303_v18 = vld [vmem:[%s235_s29 + $0x8] sm:$0xff] }
 0x53b   : > { %v1314_v28 = vcombine.low %v1290_v19, %v1306_v24  ;;  %v1315_v29 = vcombine.high %v1290_v19, %v1306_v24  ;;  %v1330_v30 = vcombine.low %v1297_v20, %v1313_v25  ;;  %v1331_v31 = vcombine.high %v1297_v20, %v1313_v25 }
 0x53c   : > { %v1588_v19 = vpack.c.bf16 %v303_v18, %v302_v16 }
 0x53d   : > { %v1322_v34 = vrot.slane %v1314_v28, %v3866_v43  ;;  %v1329_v35 = vrot.slane %v1315_v29, %v3866_v43  ;;  %v1338_v36 = vrot.slane %v1330_v30, %v3866_v43  ;;  %v1345_v37 = vrot.slane %v1331_v31, %v3866_v43  ;;  %v3664_v28 = vld [vmem:[%s4404_s3 + $0x40] sm:$0xff]   ;;  %v3665_v30 = vld [vmem:[%s4404_s3 + $0x48] sm:$0xff]  }
 0x53e   : > { %v1543_v29 = vsel %vm340_vm0, %v3664_v28, 0  ;;  %v1546_v31 = vsel %vm340_vm0, %v3665_v30, 0 }
 0x53f   : > { %v1350_v38 = vcombine.low %v1322_v34, %v1329_v35  ;;  %v3337_v39 = vcombine.high %v1322_v34, %v1329_v35  ;;  %v1366_v40 = vcombine.low %v1338_v36, %v1345_v37  ;;  %v3338_v41 = vcombine.high %v1338_v36, %v1345_v37  ;;  %3533 = vmatpush3.bf16.xpose.msra.mxu1 %v1543_v29 }
 0x540   : > { %3534 = vmatprep.subr.bf16.mxu1 %v3722_v1 }
 0x541   : > { %v1357_v44 = vrot.slane %v1350_v38, %v3856_v33  ;;  %v1365_v45 = vrot.slane %v3337_v39, %v3856_v33  ;;  %v1373_v46 = vrot.slane %v1366_v40, %v3856_v33  ;;  %v1381_v47 = vrot.slane %v3338_v41, %v3856_v33 }
 0x543   : > { %v1383_v22 = vcombine.high %v1357_v44, %v1365_v45  ;;  %v1399_v23 = vcombine.high %v1373_v46, %v1381_v47  ;;  %v1382_v48 = vcombine.low %v1357_v44, %v1365_v45  ;;  %v1398_v42 = vcombine.low %v1373_v46, %v1381_v47  ;;  %v3343_v46 = vld [vmem:[%s4405_s4 + $0x6] ss:$0 sm:$0xff] }
 0x545   : > { %v1397_v49 = vrot.slane %v1383_v22, %v3866_v43  ;;  %v1413_v50 = vrot.slane %v1399_v23, %v3866_v43  ;;  %v1390_v17 = vrot.slane %v1382_v48, %v3866_v43  ;;  %v1406_v51 = vrot.slane %v1398_v42, %v3866_v43  ;;  %v3344_v22 = vld [vmem:[%s4405_s4 + $0x7] ss:$0 sm:$0xff] }
 0x547   : > { %v1416_v53 = vcombine.low %v1397_v49, %v1413_v50  ;;  %v1415_v55 = vcombine.high %v1390_v17, %v1406_v51  ;;  %v1417_v21 = vcombine.high %v1397_v49, %v1413_v50  ;;  %v1414_v56 = vcombine.low %v1390_v17, %v1406_v51  ;;  %3535 = vmatpush3.bf16.xpose.msra.mxu1 %v1546_v31 }
 0x548   : > { %3552 = vmatprep.subr.bf16.mxu1 %v3722_v1 }
 0x549   : > { %1423 = vrot.lane.b32.xlu1 %v1416_v53, %s3731_s26  ;;  %1419 = vrot.lane.b32.xlu0 %v1415_v55, %s3732_s27 }
 0x54d   : > { %1427 = vrot.lane.b32.xlu1 %v1417_v21, %s3733_s28 }
 0x5bb   : > { %v1424_v57 = vpop.permute.xlu1 %1423  ;;  %v1420_v58 = vpop.permute.xlu0 %1419 }
 0x5bc   : > { %v1430_v59 = vsel %vm856_vm2, %v1414_v56, %v1420_v58 }
 0x5bd   : > { %v1432_v52 = vsel %vm1431_vm4, %v1430_v59, %v1424_v57 }
 0x5bf   : > { %v1428_v60 = vpop.permute.xlu1 %1427 }
 0x5c0   : > { %v1434_v61 = vsel %vm1433_vm5, %v1432_v52, %v1428_v60 }
 0x5c1   : > { %v1435_v62 = vpack.c.bf16 %v1434_v61, %v1434_v61 }
 0x5c3   : > { %3529 = vmatmul.mubr.msk.bf16.vlgmr.msra.gmra.mrb[8].mxu0 %vm340_vm0, %v1435_v62 }
 0x5c4   : > { %3548 = vmatprep.mubr.msk.bf16.mxu0 %vm3723_vm1, %v3722_v1  ;;  %3541 = vmatpush3.bf16.xpose.msra.mxu0 %v1617_v8 }
 0x5c5   : > { %3542 = vmatprep.subr.bf16.mxu0 %v3722_v1 }
 0x5cc   : > { %3543 = vmatpush3.bf16.xpose.msra.mxu0 %v1620_v10 }
 0x5cd   : > { %3544 = vmatprep.subr.bf16.mxu0 %v3722_v1 }
 0x5d4   : > { %3545 = vmatpush3.bf16.xpose.msra.mxu0 %v1623_v12 }
 0x5d5   : > { %3546 = vmatprep.subr.bf16.mxu0 %v3722_v1 }
 0x5dc   : > { %3547 = vmatpush3.bf16.xpose.msra.mxu0 %v1626_v15 }
 0x5dd   : > { %3576 = vmatprep.subr.bf16.mxu0 %v3722_v1 }
 0x5e3   : > { %3549 = vmatmul.mubr.msk.bf16.vlgmr.msra.gmra.mrb[12].mxu0 %vm340_vm0, %v1588_v19 }
 0x5e4   : > { %3578 = vmatprep.mubr.msk.bf16.mxu0 %vm3723_vm1, %v3722_v1 }
 0x696   : > { %v1493_v54 = vpop.f32.mrb[8].mxu0 }
 0x697   : > { %v1494_v0 = vadd.f32 %v3339_v63, %v1493_v54  ;;  %v3530_v2 = vpop.f32.mrb[9].mxu0 }
 0x698   : > { %v1496_v3 = vpop.f32.mrb[10].mxu0 }
 0x699   : > { %v3531_v4 = vpop.f32.mrb[11].mxu0  ;;  %v1499_v5 = vadd.f32 %v1494_v0, %v3819_v13  ;;  %v4034_v13 = vld [vmem:[%s4405_s4 + $0x2] ss:$0 sm:$0xff] }
 0x69b   : > { %v1500_v6 = vsel %vm340_vm0, %v1499_v5, 0.0 }
 0x69c   : > { %1501 = vadd.xlane.f32.xlu0 %v1500_v6 }
 0x6b2   : > { %1610 = vrot.lane.b32.xlu0 %v4034_v13, %s3726_s15 }
 0x6b6   : > { %v1662_v34 = vpop.f32.mrb[12].mxu0 }
 0x6b7   : > { %v3550_v35 = vpop.f32.mrb[13].mxu0 }
 0x6b8   : > { %v1665_v37 = vpop.f32.mrb[14].mxu0 }
 0x6b9   : > { %v3551_v39 = vpop.f32.mrb[15].mxu0 }
 0x729   : > { %v1502_v20 = vpop.xlane.xlu0 %1501 }
 0x72a   : > { %v1504_v24 = vmul.f32 0.03125, %v1502_v20 }
 0x72c   : > { %v1505_v25 = vsub.f32 %v1499_v5, %v1504_v24 }
 0x72d   : > { %v1611_v32 = vpop.permute.xlu0 %1610 }
 0x72e   : > { %v1506_v26 = vmul.f32 %v1505_v25, %v1505_v25  ;;  %v4068_v36 = vadd.f32 %v1662_v34, %v1611_v32  ;;  %v4070_v38 = vadd.f32 %v1665_v37, %v1611_v32 }
 0x730   : > { %v1507_v27 = vsel %vm340_vm0, %v1506_v26, 0.0  ;;  %1823 = vrot.lane.b32.xlu0 %v4070_v38, %s3725_s14 }
 0x731   : > { %1508 = vadd.xlane.f32.xlu1 %v1507_v27 }
 0x734   : > { %1829 = vrot.lane.b32.xlu0 %v4070_v38, %s3727_s16 }
 0x738   : > { %1835 = vrot.lane.b32.xlu0 %v4070_v38, %s3724_s13 }
 0x742   : > { %1821 = vrot.lane.b32.xlu1 %v4068_v36, %s3725_s14 }
 0x746   : > { %1827 = vrot.lane.b32.xlu1 %v4068_v36, %s3727_s16 }
 0x74a   : > { %1833 = vrot.lane.b32.xlu1 %v4068_v36, %s3724_s13 }
 0x7a2   : > { %v4099_v50 = vpop.permute.xlu0 %1823 }
 0x7a6   : > { %v4107_v55 = vpop.permute.xlu0 %1829 }
 0x7a7   : > { %v1907_v21 = vcombine.low %v4070_v38, %v4107_v55  ;;  %v1908_v56 = vcombine.high %v4070_v38, %v4107_v55 }
 0x7a9   : > { %v1915_v2 = vrot.slane %v1907_v21, %v3856_v33  ;;  %v1922_v3 = vrot.slane %v1908_v56, %v3856_v33 }
 0x7aa   : > { %v4121_v61 = vpop.permute.xlu0 %1835 }
 0x7ab   : > { %v1923_v54 = vcombine.low %v4099_v50, %v4121_v61  ;;  %v1924_v0 = vcombine.high %v4099_v50, %v4121_v61 }
 0x7ad   : > { %v1931_v8 = vrot.slane %v1923_v54, %v3856_v33  ;;  %v1938_v9 = vrot.slane %v1924_v0, %v3856_v33 }
 0x7af   : > { %v1939_v15 = vcombine.low %v1915_v2, %v1931_v8  ;;  %v1940_v16 = vcombine.high %v1915_v2, %v1931_v8  ;;  %v1955_v18 = vcombine.low %v1922_v3, %v1938_v9  ;;  %v1956_v19 = vcombine.high %v1922_v3, %v1938_v9 }
 0x7b1   : > { %v1947_v27 = vrot.slane %v1939_v15, %v3866_v43  ;;  %v1954_v28 = vrot.slane %v1940_v16, %v3866_v43  ;;  %v1963_v29 = vrot.slane %v1955_v18, %v3866_v43  ;;  %v1970_v30 = vrot.slane %v1956_v19, %v3866_v43 }
 0x7b3   : > { %v2043_v31 = vcombine.low %v1947_v27, %v1954_v28  ;;  %v3358_v32 = vcombine.high %v1947_v27, %v1954_v28  ;;  %v2059_v34 = vcombine.low %v1963_v29, %v1970_v30  ;;  %v3359_v35 = vcombine.high %v1963_v29, %v1970_v30 }
 0x7be   : > { %v1509_v40 = vpop.xlane.xlu1 %1508 }
 0x7bf   : > { %v1510_v41 = vmul.f32 0.03125, %v1509_v40 }
 0x7c1   : > { %v1511_v44 = vadd.f32 1e-05, %v1510_v41 }
 0x7c2   : > { %v4097_v49 = vpop.permute.xlu1 %1821 }
 0x7c3   : > { %3692 = vrsqrt.f32 %v1511_v44  ;;  %v2050_v44 = vrot.slane %v2043_v31, %v3856_v33 }
 0x7c6   : > { %v4101_v17 = vpop.permute.xlu1 %1827 }
 0x7c7   : > { %v1839_v51 = vcombine.low %v4068_v36, %v4101_v17  ;;  %v1840_v53 = vcombine.high %v4068_v36, %v4101_v17 }
 0x7c9   : > { %v1847_v58 = vrot.slane %v1839_v51, %v3856_v33  ;;  %v1854_v59 = vrot.slane %v1840_v53, %v3856_v33 }
 0x7ca   : > { %v4113_v57 = vpop.permute.xlu1 %1833 }
 0x7cb   : > { %v1855_v60 = vcombine.low %v4097_v49, %v4113_v57  ;;  %v1856_v52 = vcombine.high %v4097_v49, %v4113_v57 }
 0x7cd   : > { %v3693_v45 = vpop.eup %3692  ;;  %v1863_v62 = vrot.slane %v1855_v60, %v3856_v33  ;;  %v1870_v63 = vrot.slane %v1856_v52, %v3856_v33 }
 0x7ce   : > { %v1513_v47 = vmul.f32 %v3693_v45, %v1505_v25  ;;  %v2058_v45 = vrot.slane %v3358_v32, %v3856_v33 }
 0x7cf   : > { %v1871_v4 = vcombine.low %v1847_v58, %v1863_v62  ;;  %v1872_v5 = vcombine.high %v1847_v58, %v1863_v62  ;;  %v1887_v6 = vcombine.low %v1854_v59, %v1870_v63  ;;  %v1888_v7 = vcombine.high %v1854_v59, %v1870_v63 }
 0x7d0   : > { %v1518_v23 = vmul.f32 %v3343_v46, %v1513_v47  ;;  %v2066_v46 = vrot.slane %v2059_v34, %v3856_v33  ;;  %v2074_v47 = vrot.slane %v3359_v35, %v3856_v33  ;;  %v2075_v53 = vcombine.low %v2050_v44, %v2058_v45 }
 0x7d1   : > { %v1879_v10 = vrot.slane %v1871_v4, %v3866_v43  ;;  %v1886_v11 = vrot.slane %v1872_v5, %v3866_v43  ;;  %v1895_v12 = vrot.slane %v1887_v6, %v3866_v43  ;;  %v1902_v14 = vrot.slane %v1888_v7, %v3866_v43 }
 0x7d2   : > { %v4090_v48 = vadd.f32 %v3344_v22, %v1518_v23  ;;  %v2091_v21 = vcombine.low %v2066_v46, %v2074_v47  ;;  %v2076_v56 = vcombine.high %v2050_v44, %v2058_v45  ;;  %v2092_v58 = vcombine.high %v2066_v46, %v2074_v47 }
 0x7d3   : > { %v1975_v20 = vcombine.low %v1879_v10, %v1886_v11  ;;  %v3356_v24 = vcombine.high %v1879_v10, %v1886_v11  ;;  %v1991_v25 = vcombine.low %v1895_v12, %v1902_v14  ;;  %v3357_v26 = vcombine.high %v1895_v12, %v1902_v14 }
 0x7d4   : > { %v1524_v42 = vpack.c.bf16 %v4090_v48, %v4090_v48  ;;  %v2083_v63 = vrot.slane %v2075_v53, %v3866_v43  ;;  %v2099_v54 = vrot.slane %v2091_v21, %v3866_v43  ;;  %v2090_v0 = vrot.slane %v2076_v56, %v3866_v43 }
 0x7d5   : > { %v1982_v37 = vrot.slane %v1975_v20, %v3856_v33  ;;  %v1990_v39 = vrot.slane %v3356_v24, %v3856_v33  ;;  %v1998_v40 = vrot.slane %v1991_v25, %v3856_v33  ;;  %v2006_v41 = vrot.slane %v3357_v26, %v3856_v33 }
 0x7d6   : > { %3537 = vmatmul.mubr.msk.bf16.vlgmr.msra.gmra.mrb[28].mxu1 %vm340_vm0, %v1524_v42  ;;  %v2106_v2 = vrot.slane %v2092_v58, %v3866_v43  ;;  %v2107_v7 = vcombine.low %v2083_v63, %v2099_v54  ;;  %v2108_v8 = vcombine.high %v2083_v63, %v2099_v54 }
 0x7d7   : > { %3554 = vmatprep.mubr.msk.bf16.mxu1 %vm3723_vm1, %v3722_v1  ;;  %v2007_v22 = vcombine.low %v1982_v37, %v1990_v39  ;;  %v2023_v23 = vcombine.low %v1998_v40, %v2006_v41  ;;  %v2008_v42 = vcombine.high %v1982_v37, %v1990_v39  ;;  %v2024_v51 = vcombine.high %v1998_v40, %v2006_v41 }
 0x7d8   : > { %v2109_v9 = vcombine.low %v2090_v0, %v2106_v2  ;;  %v2110_v10 = vcombine.high %v2090_v0, %v2106_v2 }
 0x7d9   : > { %v2015_v59 = vrot.slane %v2007_v22, %v3866_v43  ;;  %v2031_v60 = vrot.slane %v2023_v23, %v3866_v43  ;;  %v2022_v52 = vrot.slane %v2008_v42, %v3866_v43  ;;  %v2038_v62 = vrot.slane %v2024_v51, %v3866_v43 }
 0x7db   : > { %v2039_v3 = vcombine.low %v2015_v59, %v2031_v60  ;;  %v2040_v4 = vcombine.high %v2015_v59, %v2031_v60  ;;  %v2041_v5 = vcombine.low %v2022_v52, %v2038_v62  ;;  %v2042_v6 = vcombine.high %v2022_v52, %v2038_v62 }
 0x7dd   : > { %v2111_v11 = vpack.c.bf16 %v2107_v7, %v2039_v3  ;;  %v2112_v12 = vpack.c.bf16 %v2108_v8, %v2040_v4  ;;  %v2113_v14 = vpack.c.bf16 %v2109_v9, %v2041_v5  ;;  %v4157_v15 = vpack.c.bf16 %v2110_v10, %v2042_v6 }
 0x7df   : > { %v2419_v16 = vsel %vm856_vm2, %v2111_v11, 0  ;;  %v2465_v62 = vsel %vm856_vm2, %v2112_v12, 0  ;;  %v2511_v5 = vsel %vm856_vm2, %v2113_v14, 0  ;;  %v2557_v8 = vsel %vm856_vm2, %v4157_v15, 0 }
 0x7e0   : > { %3553 = vmatpush3.bf16.xpose.msra.mxu1 %v2419_v16 }
 0x7e1   : > { %3558 = vmatprep.subr.bf16.mxu1 %v3722_v1 }
 0x8a9   : > { %v1582_v18 = vpop.f32.mrb[28].mxu1 }
 0x8aa   : > { %v1583_v19 = vadd.f32 %v4034_v13, %v1582_v18  ;;  %v3538_v20 = vpop.f32.mrb[29].mxu1 }
 0x8ab   : > { %v1585_v24 = vpop.f32.mrb[30].mxu1 }
 0x8ac   : > { %v3539_v25 = vpop.f32.mrb[31].mxu1  ;;  %1670 = vrot.lane.b32.xlu1 %v1583_v19, %s3725_s14  ;;  %1673 = vrot.lane.b32.xlu0 %v1583_v19, %s3727_s16 }
 0x8b0   : > { %1676 = vrot.lane.b32.xlu1 %v1583_v19, %s3724_s13  ;;  %2117 = vrot.lane.b32.xlu0 %v4070_v38, %s3726_s15 }
 0x8b4   : > { %2115 = vrot.lane.b32.xlu1 %v4068_v36, %s3726_s15 }
 0x8b8   : > { %2119 = vrot.lane.b32.xlu1 %v4097_v49, %s3726_s15 }
 0x8bc   : > { %2121 = vrot.lane.b32.xlu1 %v4099_v50, %s3726_s15 }
 0x91e   : > { %v1671_v13 = vpop.permute.xlu1 %1670  ;;  %v1674_v26 = vpop.permute.xlu0 %1673 }
 0x91f   : > { %v1679_v27 = vcombine.low %v1583_v19, %v1674_v26  ;;  %v1680_v28 = vcombine.high %v1583_v19, %v1674_v26 }
 0x921   : > { %v1687_v32 = vrot.slane %v1679_v27, %v3856_v33  ;;  %v1694_v38 = vrot.slane %v1680_v28, %v3856_v33 }
 0x922   : > { %v1677_v29 = vpop.permute.xlu1 %1676 }
 0x923   : > { %v1695_v30 = vcombine.low %v1671_v13, %v1677_v29  ;;  %v1696_v31 = vcombine.high %v1671_v13, %v1677_v29 }
 0x925   : > { %v1703_v34 = vrot.slane %v1695_v30, %v3856_v33  ;;  %v1710_v36 = vrot.slane %v1696_v31, %v3856_v33 }
 0x927   : > { %v1711_v35 = vcombine.low %v1687_v32, %v1703_v34  ;;  %v1712_v49 = vcombine.high %v1687_v32, %v1703_v34  ;;  %v1727_v37 = vcombine.low %v1694_v38, %v1710_v36  ;;  %v1728_v39 = vcombine.high %v1694_v38, %v1710_v36 }
 0x929   : > { %v1719_v50 = vrot.slane %v1711_v35, %v3866_v43  ;;  %v1726_v40 = vrot.slane %v1712_v49, %v3866_v43  ;;  %v1735_v41 = vrot.slane %v1727_v37, %v3866_v43  ;;  %v1742_v44 = vrot.slane %v1728_v39, %v3866_v43  ;;  %v4216_v39 = vpop.permute.xlu1 %2115 }
 0x92b   : > { %v1747_v45 = vcombine.low %v1719_v50, %v1726_v40  ;;  %v3354_v46 = vcombine.high %v1719_v50, %v1726_v40  ;;  %v1763_v47 = vcombine.low %v1735_v41, %v1742_v44  ;;  %v3355_v22 = vcombine.high %v1735_v41, %v1742_v44  ;;  %v2118_v50 = vpop.permute.xlu0 %2117 }
 0x92d   : > { %v1754_v23 = vrot.slane %v1747_v45, %v3856_v33  ;;  %v1762_v42 = vrot.slane %v3354_v46, %v3856_v33  ;;  %v1770_v51 = vrot.slane %v1763_v47, %v3856_v33  ;;  %v1778_v53 = vrot.slane %v3355_v22, %v3856_v33  ;;  %v4218_v40 = vpop.permute.xlu1 %2119 }
 0x92f   : > { %v1779_v21 = vcombine.low %v1754_v23, %v1762_v42  ;;  %v1795_v56 = vcombine.low %v1770_v51, %v1778_v53  ;;  %v1780_v63 = vcombine.high %v1754_v23, %v1762_v42  ;;  %v1796_v54 = vcombine.high %v1770_v51, %v1778_v53 }
 0x931   : > { %v1787_v58 = vrot.slane %v1779_v21, %v3866_v43  ;;  %v1803_v59 = vrot.slane %v1795_v56, %v3866_v43  ;;  %v1794_v3 = vrot.slane %v1780_v63, %v3866_v43  ;;  %v1810_v4 = vrot.slane %v1796_v54, %v3866_v43  ;;  %v2122_v46 = vpop.permute.xlu1 %2121 }
 0x933   : > { %v1811_v60 = vcombine.low %v1787_v58, %v1803_v59  ;;  %v1812_v0 = vcombine.high %v1787_v58, %v1803_v59  ;;  %v1813_v6 = vcombine.low %v1794_v3, %v1810_v4  ;;  %v1814_v9 = vcombine.high %v1794_v3, %v1810_v4 }
 0x935   : > { %v1815_v52 = vpack.c.bf16 %v1811_v60, %v1811_v60  ;;  %v1816_v2 = vpack.c.bf16 %v1812_v0, %v1812_v0  ;;  %v1817_v7 = vpack.c.bf16 %v1813_v6, %v1813_v6  ;;  %v1818_v10 = vpack.c.bf16 %v1814_v9, %v1814_v9 }
 0x937   : > { %3555 = vmatmul.mubr.msk.bf16.vlgmr.msra.gmra.mrb[32].mxu1 %vm856_vm2, %v1815_v52 }
 0x938   : > { %3559 = vmatpush3.bf16.xpose.msra.mxu1 %v2465_v62  ;;  %3560 = vmatprep.mubr.msk.bf16.mxu1 %vm3723_vm1, %v3722_v1 }
 0x939   : > { %3564 = vmatprep.subr.bf16.mxu1 %v3722_v1 }
 0x93f   : > { %3561 = vmatmul.mubr.msk.bf16.vlgmr.msra.gmra.mrb[36].mxu1 %vm856_vm2, %v1816_v2 }
 0x940   : > { %3565 = vmatpush3.bf16.xpose.msra.mxu1 %v2511_v5  ;;  %3566 = vmatprep.mubr.msk.bf16.mxu1 %vm3723_vm1, %v3722_v1 }
 0x941   : > { %3570 = vmatprep.subr.bf16.mxu1 %v3722_v1 }
 0x947   : > { %3567 = vmatmul.mubr.msk.bf16.vlgmr.msra.gmra.mrb[40].mxu1 %vm856_vm2, %v1817_v7 }
 0x948   : > { %3571 = vmatpush3.bf16.xpose.msra.mxu1 %v2557_v8  ;;  %3572 = vmatprep.mubr.msk.bf16.mxu1 %vm3723_vm1, %v3722_v1 }
 0x949   : > { %3582 = vmatprep.subr.bf16.mxu1 %v3722_v1 }
 0x94f   : > { %3573 = vmatmul.mubr.msk.bf16.vlgmr.msra.gmra.mrb[44].mxu1 %vm856_vm2, %v1818_v10 }
 0x950   : > { %3584 = vmatprep.mubr.msk.bf16.mxu1 %vm3723_vm1, %v3722_v1 }
 0xa0a   : > { %v2455_v11 = vpop.f32.mrb[32].mxu1 }
 0xa0b   : > { %v2599_v12 = vmul.f32 0.35355338, %v2455_v11  ;;  %v3556_v14 = vpop.f32.mrb[33].mxu1 }
 0xa0c   : > { %v2458_v16 = vpop.f32.mrb[34].mxu1 }
 0xa0d   : > { %v3557_v18 = vpop.f32.mrb[35].mxu1  ;;  %v2603_v15 = vsel %vm1431_vm4, %v2599_v12, -inf }
 0xa0e   : > { %2604 = vmax.xlane.f32.xlu0 %v2603_v15 }
 0xa12   : > { %v2501_v19 = vpop.f32.mrb[36].mxu1 }
 0xa13   : > { %v2600_v20 = vmul.f32 0.35355338, %v2501_v19  ;;  %v3562_v24 = vpop.f32.mrb[37].mxu1 }
 0xa14   : > { %v2504_v25 = vpop.f32.mrb[38].mxu1 }
 0xa15   : > { %v3563_v13 = vpop.f32.mrb[39].mxu1  ;;  %v2606_v26 = vsel %vm1431_vm4, %v2600_v20, -inf }
 0xa16   : > { %2607 = vmax.xlane.f32.xlu1 %v2606_v26 }
 0xa1a   : > { %v2547_v27 = vpop.f32.mrb[40].mxu1 }
 0xa1b   : > { %v2601_v28 = vmul.f32 0.35355338, %v2547_v27  ;;  %v3568_v29 = vpop.f32.mrb[41].mxu1 }
 0xa1c   : > { %v2550_v30 = vpop.f32.mrb[42].mxu1 }
 0xa1d   : > { %v3569_v31 = vpop.f32.mrb[43].mxu1  ;;  %v2609_v32 = vsel %vm1431_vm4, %v2601_v28, -inf }
 0xa1e   : > { %2610 = vmax.xlane.f32.xlu0 %v2609_v32 }
 0xa22   : > { %v2593_v38 = vpop.f32.mrb[44].mxu1 }
 0xa23   : > { %v2602_v34 = vmul.f32 0.35355338, %v2593_v38  ;;  %v3574_v36 = vpop.f32.mrb[45].mxu1 }
 0xa24   : > { %v2596_v35 = vpop.f32.mrb[46].mxu1 }
 0xa25   : > { %v3575_v49 = vpop.f32.mrb[47].mxu1  ;;  %v2612_v37 = vsel %vm1431_vm4, %v2602_v34, -inf }
 0xa26   : > { %2613 = vmax.xlane.f32.xlu0 %v2612_v37 }
 0xa27   : > { %2125 = vrot.lane.b32.xlu1 %v4107_v55, %s3726_s15 }
 0xa3c   : > { %2123 = vrot.lane.b32.xlu0 %v4101_v17, %s3726_s15 }
 0xa9b   : > { %v2605_v41 = vpop.xlane.xlu0 %2604 }
 0xa9c   : > { %v2615_v44 = vsub.f32 %v2599_v12, %v2605_v41 }
 0xa9e   : > { %v2619_v45 = vmul.f32 1.442695, %v2615_v44 }
 0xaa0   : > { %3694 = vpow2.f32 %v2619_v45 }
 0xaa3   : > { %v2608_v47 = vpop.xlane.xlu1 %2607 }
 0xaa4   : > { %v2616_v22 = vsub.f32 %v2600_v20, %v2608_v47 }
 0xaa6   : > { %v2621_v23 = vmul.f32 1.442695, %v2616_v22 }
 0xaa7   : > { %v2126_v54 = vpop.permute.xlu1 %2125 }
 0xaa8   : > { %3696 = vpow2.f32 %v2621_v23  ;;  %v2207_v0 = vcombine.low %v2118_v50, %v2126_v54  ;;  %v2208_v2 = vcombine.high %v2118_v50, %v2126_v54 }
 0xaaa   : > { %v4220_v42 = vpop.eup %3694  ;;  %v2215_v7 = vrot.slane %v2207_v0, %v3856_v33  ;;  %v2222_v8 = vrot.slane %v2208_v2, %v3856_v33 }
 0xaab   : > { %v2627_v55 = vsel %vm1431_vm4, %v4220_v42, 0.0  ;;  %v2611_v53 = vpop.xlane.xlu0 %2610 }
 0xaac   : > { %2628 = vadd.xlane.f32.xlu1 %v2627_v55  ;;  %v2617_v59 = vsub.f32 %v2601_v28, %v2611_v53 }
 0xaae   : > { %v2623_v60 = vmul.f32 1.442695, %v2617_v59 }
 0xab2   : > { %v4224_v17 = vpop.eup %3696 }
 0xab3   : > { %v2630_v51 = vsel %vm1431_vm4, %v4224_v17, 0.0  ;;  %v2614_v21 = vpop.xlane.xlu0 %2613 }
 0xab4   : > { %2631 = vadd.xlane.f32.xlu0 %v2630_v51  ;;  %v2618_v56 = vsub.f32 %v2602_v34, %v2614_v21 }
 0xab6   : > { %v2625_v58 = vmul.f32 1.442695, %v2618_v56 }
 0xab7   : > { %v2124_v3 = vpop.permute.xlu0 %2123 }
 0xab8   : > { %3698 = vpow2.f32 %v2625_v58  ;;  %v2139_v15 = vcombine.low %v4216_v39, %v2124_v3  ;;  %v2140_v13 = vcombine.high %v4216_v39, %v2124_v3 }
 0xab9   : > { %3700 = vpow2.f32 %v2623_v60 }
 0xaba   : > { %v2147_v38 = vrot.slane %v2139_v15, %v3856_v33  ;;  %v2154_v34 = vrot.slane %v2140_v13, %v3856_v33 }
 0xabd   : > { %2129 = vrot.lane.b32.xlu1 %v4121_v61, %s3726_s15 }
 0xac2   : > { %v4232_v52 = vpop.eup %3698 }
 0xac3   : > { %v2636_v62 = vsel %vm1431_vm4, %v4232_v52, 0.0  ;;  %v4236_v63 = vpop.eup %3700 }
 0xac4   : > { %v2633_v61 = vsel %vm1431_vm4, %v4236_v63, 0.0 }
 0xaca   : > { %2127 = vrot.lane.b32.xlu0 %v4113_v57, %s3726_s15 }
 0xae1   : > { %2637 = vadd.xlane.f32.xlu1 %v2636_v62 }
 0xae9   : > { %2634 = vadd.xlane.f32.xlu0 %v2633_v61 }
 0xb39   : > { %v2629_v57 = vpop.xlane.xlu1 %2628 }
 0xb3a   : > { %3702 = vrcp.f32 %v2629_v57 }
 0xb3d   : > { %v2130_v4 = vpop.permute.xlu1 %2129 }
 0xb3e   : > { %v2223_v5 = vcombine.low %v2122_v46, %v2130_v4  ;;  %v2224_v6 = vcombine.high %v2122_v46, %v2130_v4 }
 0xb40   : > { %v2231_v9 = vrot.slane %v2223_v5, %v3856_v33  ;;  %v2238_v10 = vrot.slane %v2224_v6, %v3856_v33 }
 0xb41   : > { %v2632_v11 = vpop.xlane.xlu0 %2631 }
 0xb42   : > { %v2239_v12 = vcombine.low %v2215_v7, %v2231_v9  ;;  %v2240_v14 = vcombine.high %v2215_v7, %v2231_v9  ;;  %v2255_v16 = vcombine.low %v2222_v8, %v2238_v10  ;;  %v2256_v18 = vcombine.high %v2222_v8, %v2238_v10 }
 0xb43   : > { %3704 = vrcp.f32 %v2632_v11 }
 0xb44   : > { %v2247_v19 = vrot.slane %v2239_v12, %v3866_v43  ;;  %v2254_v20 = vrot.slane %v2240_v14, %v3866_v43  ;;  %v2263_v24 = vrot.slane %v2255_v16, %v3866_v43  ;;  %v2270_v25 = vrot.slane %v2256_v18, %v3866_v43  ;;  %v3703_v54 = vpop.eup %3702 }
 0xb45   : > { %v2128_v26 = vpop.permute.xlu0 %2127 }
 0xb46   : > { %v2343_v27 = vcombine.low %v2247_v19, %v2254_v20  ;;  %v3362_v28 = vcombine.high %v2247_v19, %v2254_v20  ;;  %v2359_v29 = vcombine.low %v2263_v24, %v2270_v25  ;;  %v3363_v30 = vcombine.high %v2263_v24, %v2270_v25 }
 0xb47   : > { %v2155_v31 = vcombine.low %v4218_v40, %v2128_v26  ;;  %v2156_v32 = vcombine.high %v4218_v40, %v2128_v26  ;;  %v2643_v24 = vmul.f32 %v3703_v54, %v4220_v42 }
 0xb48   : > { %v2350_v49 = vrot.slane %v2343_v27, %v3856_v33  ;;  %v2358_v37 = vrot.slane %v3362_v28, %v3856_v33  ;;  %v2366_v39 = vrot.slane %v2359_v29, %v3856_v33  ;;  %v2374_v50 = vrot.slane %v3363_v30, %v3856_v33 }
 0xb49   : > { %v2163_v36 = vrot.slane %v2155_v31, %v3856_v33  ;;  %v2170_v35 = vrot.slane %v2156_v32, %v3856_v33  ;;  %v2647_v31 = vpack.c.bf16 %v2643_v24, %v2643_v24 }
 0xb4a   : > { %v2375_v55 = vcombine.low %v2350_v49, %v2358_v37  ;;  %v2391_v51 = vcombine.low %v2366_v39, %v2374_v50  ;;  %v2376_v2 = vcombine.high %v2350_v49, %v2358_v37  ;;  %v2392_v3 = vcombine.high %v2366_v39, %v2374_v50 }
 0xb4b   : > { %v2171_v41 = vcombine.low %v2147_v38, %v2163_v36  ;;  %v2172_v40 = vcombine.high %v2147_v38, %v2163_v36  ;;  %v2187_v44 = vcombine.low %v2154_v34, %v2170_v35  ;;  %v2188_v45 = vcombine.high %v2154_v34, %v2170_v35 }
 0xb4c   : > { %v2383_v57 = vrot.slane %v2375_v55, %v3866_v43  ;;  %v2399_v0 = vrot.slane %v2391_v51, %v3866_v43  ;;  %v2390_v14 = vrot.slane %v2376_v2, %v3866_v43  ;;  %v2406_v16 = vrot.slane %v2392_v3, %v3866_v43 }
 0xb4d   : > { %v2179_v46 = vrot.slane %v2171_v41, %v3866_v43  ;;  %v2186_v47 = vrot.slane %v2172_v40, %v3866_v43  ;;  %v2195_v22 = vrot.slane %v2187_v44, %v3866_v43  ;;  %v2202_v23 = vrot.slane %v2188_v45, %v3866_v43  ;;  %v3705_v4 = vpop.eup %3704  ;;  %v3666_v41 = vld [vmem:[%s4404_s3 + $0x70] sm:$0xff]  }
 0xb4e   : > { %v2407_v15 = vcombine.low %v2383_v57, %v2399_v0  ;;  %v2408_v20 = vcombine.high %v2383_v57, %v2399_v0  ;;  %v2644_v25 = vmul.f32 %v3705_v4, %v4224_v17  ;;  %v2409_v29 = vcombine.low %v2390_v14, %v2406_v16 }
 0xb4f   : > { %v2275_v53 = vcombine.low %v2179_v46, %v2186_v47  ;;  %v3360_v21 = vcombine.high %v2179_v46, %v2186_v47  ;;  %v2291_v56 = vcombine.low %v2195_v22, %v2202_v23  ;;  %v3361_v58 = vcombine.high %v2195_v22, %v2202_v23 }
 0xb50   : > { %v2410_v30 = vcombine.high %v2390_v14, %v2406_v16  ;;  %v2648_v32 = vpack.c.bf16 %v2644_v25, %v2644_v25 }
 0xb51   : > { %v2282_v59 = vrot.slane %v2275_v53, %v3856_v33  ;;  %v2290_v60 = vrot.slane %v3360_v21, %v3856_v33  ;;  %v2298_v62 = vrot.slane %v2291_v56, %v3856_v33  ;;  %v2306_v61 = vrot.slane %v3361_v58, %v3856_v33 }
 0xb53   : > { %v2307_v5 = vcombine.low %v2282_v59, %v2290_v60  ;;  %v2323_v6 = vcombine.low %v2298_v62, %v2306_v61  ;;  %v2308_v7 = vcombine.high %v2282_v59, %v2290_v60  ;;  %v2324_v8 = vcombine.high %v2298_v62, %v2306_v61 }
 0xb55   : > { %v2315_v9 = vrot.slane %v2307_v5, %v3866_v43  ;;  %v2331_v10 = vrot.slane %v2323_v6, %v3866_v43  ;;  %v2322_v11 = vrot.slane %v2308_v7, %v3866_v43  ;;  %v2338_v12 = vrot.slane %v2324_v8, %v3866_v43 }
 0xb57   : > { %v2339_v18 = vcombine.low %v2315_v9, %v2331_v10  ;;  %v2340_v19 = vcombine.high %v2315_v9, %v2331_v10  ;;  %v2341_v27 = vcombine.low %v2322_v11, %v2338_v12  ;;  %v2342_v28 = vcombine.high %v2322_v11, %v2338_v12  ;;  %v3667_v9 = vld [vmem:[%s4404_s3 + $0x78] sm:$0xff]  }
 0xb58   : > { %v2996_v16 = vsel %vm340_vm0, %v3667_v9, 0 }
 0xb59   : > { %v2411_v13 = vpack.c.bf16 %v2407_v15, %v2339_v18  ;;  %v2412_v26 = vpack.c.bf16 %v2408_v20, %v2340_v19  ;;  %v2413_v38 = vpack.c.bf16 %v2409_v29, %v2341_v27  ;;  %v2414_v34 = vpack.c.bf16 %v2410_v30, %v2342_v28 }
 0xb5b   : > { %3577 = vmatpush3.bf16.msra.mxu0 %v2411_v13  ;;  %3583 = vmatpush3.bf16.msra.mxu1 %v2412_v26 }
 0xb5c   : > { %3588 = vmatprep.subr.bf16.mxu0 %v3722_v1  ;;  %3594 = vmatprep.subr.bf16.mxu1 %v3722_v1 }
 0xb5e   : > { %3579 = vmatmul.mubr.msk.bf16.vlgmr.msra.gmra.mrb[16].mxu0 %vm1431_vm4, %v2647_v31  ;;  %3585 = vmatmul.mubr.msk.bf16.vlgmr.msra.gmra.mrb[48].mxu1 %vm1431_vm4, %v2648_v32 }
 0xb5f   : > { %3589 = vmatpush3.bf16.msra.mxu0 %v2413_v38  ;;  %3595 = vmatpush3.bf16.msra.mxu1 %v2414_v34 }
 0xb60   : > { %3596 = vmatprep.mubr.msk.bf16.mxu1 %vm3723_vm1, %v3722_v1  ;;  %3590 = vmatprep.mubr.msk.bf16.mxu0 %vm3723_vm1, %v3722_v1 }
 0xb61   : > { %3600 = vmatprep.subr.bf16.mxu0 %v3722_v1  ;;  %3608 = vmatprep.subr.bf16.mxu1 %v3722_v1 }
 0xb6e   : > { %v2638_v42 = vpop.xlane.xlu1 %2637 }
 0xb6f   : > { %3706 = vrcp.f32 %v2638_v42 }
 0xb76   : > { %v2635_v17 = vpop.xlane.xlu0 %2634 }
 0xb77   : > { %3708 = vrcp.f32 %v2635_v17 }
 0xb79   : > { %v3707_v36 = vpop.eup %3706 }
 0xb7a   : > { %v2646_v35 = vmul.f32 %v3707_v36, %v4232_v52  ;;  %v2993_v52 = vsel %vm340_vm0, %v3666_v41, 0 }
 0xb7c   : > { %v2650_v49 = vpack.c.bf16 %v2646_v35, %v2646_v35 }
 0xb7e   : > { %3597 = vmatmul.mubr.msk.bf16.vlgmr.msra.gmra.mrb[52].mxu1 %vm1431_vm4, %v2650_v49 }
 0xb7f   : > { %3616 = vmatprep.mubr.msk.bf16.mxu1 %vm3723_vm1, %v3722_v1 }
 0xb81   : > { %v3709_v37 = vpop.eup %3708 }
 0xb82   : > { %v2645_v39 = vmul.f32 %v3709_v37, %v4236_v63 }
 0xb84   : > { %v2649_v50 = vpack.c.bf16 %v2645_v39, %v2645_v39 }
 0xb86   : > { %3591 = vmatmul.mubr.msk.bf16.vlgmr.msra.gmra.mrb[20].mxu0 %vm1431_vm4, %v2649_v50 }
 0xb87   : > { %3604 = vmatprep.mubr.msk.bf16.mxu0 %vm3723_vm1, %v3722_v1  ;;  %3601 = vmatpush3.bf16.xpose.msra.mxu0 %v2993_v52  ;;  %v3374_v52 = vld [vmem:[%s4405_s4 + $0x3] ss:$0 sm:$0xff] }
 0xb88   : > { %3602 = vmatprep.subr.bf16.mxu0 %v3722_v1 }
 0xb8f   : > { %3603 = vmatpush3.bf16.xpose.msra.mxu0 %v2996_v16  ;;  %v3380_v16 = vld [vmem:[%s4405_s4 + $0x4] ss:$0 sm:$0xff] }
 0xb90   : > { %3620 = vmatprep.subr.bf16.mxu0 %v3722_v1 }
 0xc31   : > { %v2688_v40 = vpop.f32.mrb[16].mxu0  ;;  %v2731_v44 = vpop.f32.mrb[48].mxu1 }
 0xc32   : > { %v3580_v45 = vpop.f32.mrb[17].mxu0  ;;  %v3586_v46 = vpop.f32.mrb[49].mxu1 }
 0xc33   : > { %v2691_v63 = vpop.f32.mrb[18].mxu0  ;;  %v2734_v47 = vpop.f32.mrb[50].mxu1 }
 0xc34   : > { %v3581_v22 = vpop.f32.mrb[19].mxu0  ;;  %v3587_v23 = vpop.f32.mrb[51].mxu1 }
 0xc35   : > { %v3668_v23 = vld [vmem:[%s4404_s3 + $0x80] sm:$0xff]  }
 0xc51   : > { %v2817_v55 = vpop.f32.mrb[52].mxu1 }
 0xc52   : > { %v2839_v51 = vcombine.low %v2731_v44, %v2817_v55  ;;  %v2840_v53 = vcombine.high %v2731_v44, %v2817_v55  ;;  %v3598_v21 = vpop.f32.mrb[53].mxu1  ;;  %v3091_v55 = vsel %vm340_vm0, %v3668_v23, 0 }
 0xc53   : > { %v2820_v56 = vpop.f32.mrb[54].mxu1  ;;  %3609 = vmatpush3.bf16.xpose.msra.mxu1 %v3091_v55 }
 0xc54   : > { %v3599_v58 = vpop.f32.mrb[55].mxu1  ;;  %v2847_v57 = vrot.slane %v2839_v51, %v3856_v33  ;;  %v2854_v0 = vrot.slane %v2840_v53, %v3856_v33  ;;  %3610 = vmatprep.subr.bf16.mxu1 %v3722_v1 }
 0xc59   : > { %v2774_v59 = vpop.f32.mrb[20].mxu0 }
 0xc5a   : > { %v2823_v60 = vcombine.low %v2688_v40, %v2774_v59  ;;  %v2824_v62 = vcombine.high %v2688_v40, %v2774_v59  ;;  %v3592_v61 = vpop.f32.mrb[21].mxu0 }
 0xc5b   : > { %v2777_v54 = vpop.f32.mrb[22].mxu0  ;;  %v3671_v61 = vld [vmem:[%s4404_s3 + $0x98] sm:$0xff]  }
 0xc5c   : > { %v2831_v2 = vrot.slane %v2823_v60, %v3856_v33  ;;  %v2838_v3 = vrot.slane %v2824_v62, %v3856_v33  ;;  %v3593_v4 = vpop.f32.mrb[23].mxu0  ;;  %v3670_v60 = vld [vmem:[%s4404_s3 + $0x90] sm:$0xff]   ;;  %v3100_v54 = vsel %vm340_vm0, %v3671_v61, 0 }
 0xc5d   : > { %v3097_v62 = vsel %vm340_vm0, %v3670_v60, 0 }
 0xc5e   : > { %v2855_v5 = vcombine.low %v2831_v2, %v2847_v57  ;;  %v2856_v6 = vcombine.high %v2831_v2, %v2847_v57  ;;  %v2871_v7 = vcombine.low %v2838_v3, %v2854_v0  ;;  %v2872_v8 = vcombine.high %v2838_v3, %v2854_v0  ;;  %v3672_v57 = vld [vmem:[%s4404_s3 + $0xa0] sm:$0xff]   ;;  %v3673_v0 = vld [vmem:[%s4404_s3 + $0xa8] sm:$0xff]  }
 0xc60   : > { %v2863_v10 = vrot.slane %v2855_v5, %v3866_v43  ;;  %v2870_v11 = vrot.slane %v2856_v6, %v3866_v43  ;;  %v2879_v12 = vrot.slane %v2871_v7, %v3866_v43  ;;  %v2886_v14 = vrot.slane %v2872_v8, %v3866_v43  ;;  %v3378_v6 = vld [vmem:[%s4405_s4 + $0x8] ss:$0 sm:$0xff]  ;;  %v3379_v8 = vld [vmem:[%s4405_s4 + $0x9] ss:$0 sm:$0xff] }
 0xc62   : > { %v2891_v18 = vcombine.low %v2863_v10, %v2870_v11  ;;  %v3372_v15 = vcombine.high %v2863_v10, %v2870_v11  ;;  %v2907_v19 = vcombine.low %v2879_v12, %v2886_v14  ;;  %v3373_v20 = vcombine.high %v2879_v12, %v2886_v14  ;;  %v3674_v12 = vld [vmem:[%s4404_s3 + $0xb0] sm:$0xff]   ;;  %v3675_v14 = vld [vmem:[%s4404_s3 + $0xb8] sm:$0xff]  }
 0xc64   : > { %v2898_v24 = vrot.slane %v2891_v18, %v3856_v33  ;;  %v2906_v25 = vrot.slane %v3372_v15, %v3856_v33  ;;  %v2914_v13 = vrot.slane %v2907_v19, %v3856_v33  ;;  %v2922_v26 = vrot.slane %v3373_v20, %v3856_v33 }
 0xc66   : > { %v2924_v27 = vcombine.high %v2898_v24, %v2906_v25  ;;  %v2940_v28 = vcombine.high %v2914_v13, %v2922_v26  ;;  %v2923_v29 = vcombine.low %v2898_v24, %v2906_v25  ;;  %v2939_v30 = vcombine.low %v2914_v13, %v2922_v26 }
 0xc68   : > { %v2938_v31 = vrot.slane %v2924_v27, %v3866_v43  ;;  %v2954_v32 = vrot.slane %v2940_v28, %v3866_v43  ;;  %v2931_v38 = vrot.slane %v2923_v29, %v3866_v43  ;;  %v2947_v34 = vrot.slane %v2939_v30, %v3866_v43 }
 0xc6a   : > { %v2957_v42 = vcombine.low %v2938_v31, %v2954_v32  ;;  %v2956_v17 = vcombine.high %v2931_v38, %v2947_v34  ;;  %v2958_v36 = vcombine.high %v2938_v31, %v2954_v32  ;;  %v2955_v35 = vcombine.low %v2931_v38, %v2947_v34 }
 0xc6c   : > { %2964 = vrot.lane.b32.xlu1 %v2957_v42, %s3731_s26  ;;  %2960 = vrot.lane.b32.xlu0 %v2956_v17, %s3732_s27 }
 0xc70   : > { %2968 = vrot.lane.b32.xlu0 %v2958_v36, %s3733_s28 }
 0xcde   : > { %v2961_v33 = vpop.permute.xlu0 %2960  ;;  %v2965_v49 = vpop.permute.xlu1 %2964 }
 0xcdf   : > { %v2971_v37 = vsel %vm856_vm2, %v2955_v35, %v2961_v33 }
 0xce0   : > { %v2972_v50 = vsel %vm1431_vm4, %v2971_v37, %v2965_v49 }
 0xce2   : > { %v2969_v39 = vpop.permute.xlu0 %2968 }
 0xce3   : > { %v2973_v41 = vsel %vm1433_vm5, %v2972_v50, %v2969_v39  ;;  %v3392_v39 = vld [vmem:[%s4405_s4 + $0xa] ss:$0 sm:$0xff] }
 0xce4   : > { %v2974_v43 = vpack.c.bf16 %v2973_v41, %v2973_v41  ;;  %v3393_v41 = vld [vmem:[%s4405_s4 + $0xb] ss:$0 sm:$0xff] }
 0xce6   : > { %3605 = vmatmul.mubr.msk.bf16.vlgmr.msra.gmra.mrb[24].mxu0 %vm340_vm0, %v2974_v43 }
 0xce7   : > { %3628 = vmatprep.mubr.msk.bf16.mxu0 %vm3723_vm1, %v3722_v1  ;;  %3621 = vmatpush3.bf16.msra.mxu0 %v3672_v57 }
 0xce8   : > { %3622 = vmatprep.subr.bf16.mxu0 %v3722_v1 }
 0xceb   : > { %3623 = vmatpush3.bf16.msra.mxu0 %v3673_v0 }
 0xcec   : > { %3624 = vmatprep.subr.bf16.mxu0 %v3722_v1 }
 0xcef   : > { %3625 = vmatpush3.bf16.msra.mxu0 %v3674_v12 }
 0xcf0   : > { %3626 = vmatprep.subr.bf16.mxu0 %v3722_v1 }
 0xcf3   : > { %3627 = vmatpush3.bf16.msra.mxu0 %v3675_v14 }
 0xdb9   : > { %v3032_v40 = vpop.f32.mrb[24].mxu0 }
 0xdba   : > { %v3033_v44 = vadd.f32 %v3374_v52, %v3032_v40  ;;  %v3606_v45 = vpop.f32.mrb[25].mxu0 }
 0xdbb   : > { %v3035_v46 = vpop.f32.mrb[26].mxu0 }
 0xdbc   : > { %v3607_v63 = vpop.f32.mrb[27].mxu0  ;;  %v3038_v47 = vadd.f32 %v3033_v44, %v4090_v48  ;;  %v3669_v48 = vld [vmem:[%s4404_s3 + $0x88] sm:$0xff]  }
 0xdbd   : > { %v3094_v59 = vsel %vm340_vm0, %v3669_v48, 0 }
 0xdbe   : > { %v3039_v22 = vsel %vm340_vm0, %v3038_v47, 0.0  ;;  %3611 = vmatpush3.bf16.xpose.msra.mxu1 %v3094_v59 }
 0xdbf   : > { %3040 = vadd.xlane.f32.xlu1 %v3039_v22  ;;  %3612 = vmatprep.subr.bf16.mxu1 %v3722_v1 }
 0xdc6   : > { %3613 = vmatpush3.bf16.xpose.msra.mxu1 %v3097_v62 }
 0xdc7   : > { %3614 = vmatprep.subr.bf16.mxu1 %v3722_v1  ;;  %v3386_v1 = vld [vmem:[%s4405_s4 + $0x5] ss:$0 sm:$0xff] }
 0xdce   : > { %3615 = vmatpush3.bf16.xpose.msra.mxu1 %v3100_v54 }
 0xe4c   : > { %v3041_v51 = vpop.xlane.xlu1 %3040 }
 0xe4d   : > { %v3042_v53 = vmul.f32 0.03125, %v3041_v51 }
 0xe4f   : > { %v3043_v21 = vsub.f32 %v3038_v47, %v3042_v53 }
 0xe51   : > { %v3044_v56 = vmul.f32 %v3043_v21, %v3043_v21 }
 0xe53   : > { %v3045_v58 = vsel %vm340_vm0, %v3044_v56, 0.0 }
 0xe54   : > { %3046 = vadd.xlane.f32.xlu0 %v3045_v58 }
 0xee1   : > { %v3047_v2 = vpop.xlane.xlu0 %3046 }
 0xee2   : > { %v3048_v3 = vmul.f32 0.03125, %v3047_v2 }
 0xee4   : > { %v3049_v4 = vadd.f32 1e-05, %v3048_v3 }
 0xee6   : > { %3710 = vrsqrt.f32 %v3049_v4 }
 0xef0   : > { %v3711_v5 = vpop.eup %3710 }
 0xef1   : > { %v3051_v7 = vmul.f32 %v3711_v5, %v3043_v21 }
 0xef3   : > { %v3056_v9 = vmul.f32 %v3378_v6, %v3051_v7 }
 0xef5   : > { %v3061_v10 = vadd.f32 %v3379_v8, %v3056_v9 }
 0xef7   : > { %v3062_v11 = vpack.c.bf16 %v3061_v10, %v3061_v10 }
 0xef9   : > { %3617 = vmatmul.mubr.msk.bf16.vlgmr.msra.gmra.mrb[56].mxu1 %vm340_vm0, %v3062_v11 }
 0xfcc   : > { %v3136_v18 = vpop.f32.mrb[56].mxu1 }
 0xfcd   : > { %v3137_v15 = vadd.f32 %v3380_v16, %v3136_v18  ;;  %v3618_v19 = vpop.f32.mrb[57].mxu1 }
 0xfce   : > { %v3139_v20 = vpop.f32.mrb[58].mxu1 }
 0xfcf   : > { %v3142_v24 = vmax.f32 %v3137_v15, 0.0  ;;  %v3619_v25 = vpop.f32.mrb[59].mxu1 }
 0xfd1   : > { %v3143_v13 = vpack.c.bf16 %v3142_v24, %v3142_v24 }
 0xfd3   : > { %3629 = vmatmul.mubr.msk.bf16.vlgmr.msra.gmra.mrb[28].mxu0 %vm3172_vm6, %v3143_v13 }
0x10a6   : > { %v3210_v26 = vpop.f32.mrb[28].mxu0 }
0x10a7   : > { %v3211_v27 = vadd.f32 %v3386_v1, %v3210_v26  ;;  %v3630_v28 = vpop.f32.mrb[29].mxu0 }
0x10a8   : > { %v3213_v29 = vpop.f32.mrb[30].mxu0 }
0x10a9   : > { %v3631_v30 = vpop.f32.mrb[31].mxu0  ;;  %v3216_v31 = vadd.f32 %v3211_v27, %v3061_v10 }
0x10ab   : > { %v3217_v32 = vsel %vm340_vm0, %v3216_v31, 0.0 }
0x10ac   : > { %3218 = vadd.xlane.f32.xlu0 %v3217_v32 }
0x1139   : > { %v3219_v38 = vpop.xlane.xlu0 %3218 }
0x113a   : > { %v3220_v34 = vmul.f32 0.03125, %v3219_v38 }
0x113c   : > { %v3221_v42 = vsub.f32 %v3216_v31, %v3220_v34 }
0x113e   : > { %v3222_v17 = vmul.f32 %v3221_v42, %v3221_v42 }
0x1140   : > { %v3223_v36 = vsel %vm340_vm0, %v3222_v17, 0.0 }
0x1141   : > { %3224 = vadd.xlane.f32.xlu1 %v3223_v36 }
0x11ce   : > { %v3225_v35 = vpop.xlane.xlu1 %3224 }
0x11cf   : > { %v3226_v33 = vmul.f32 0.03125, %v3225_v35 }
0x11d1   : > { %v3227_v49 = vadd.f32 1e-05, %v3226_v33 }
0x11d3   : > { %3712 = vrsqrt.f32 %v3227_v49 }
0x11dd   : > { %v3713_v37 = vpop.eup %3712 }
0x11de   : > { %v3229_v50 = vmul.f32 %v3713_v37, %v3221_v42 }
0x11e0   : > { %v3234_v43 = vmul.f32 %v3392_v39, %v3229_v50 }
0x11e2   : > { %v3239_v52 = vadd.f32 %v3393_v41, %v3234_v43 }
0x11e4   : > { %3240 = vst.msk [vmem:[%s239_s30] sm:$0xff] %vm340_vm0, %v3239_v52 }
0x11e5 PF: > { %s15_s18 = sadd.s32 1, %s3720_s18  }
0x11e6   : > { %p12_p4 = scmp.ge.s32.totalorder %s15_s18, 4  }
0x11e8   :  { %14 = sbr.rel (!%p12_p4) target bundleno = 1 (0x1), region = 73 }

</bundles_post_ra>
